<compile_context>
chip_gen: v5e
topology: v5e:2x2
jax: 0.10.0
libtpu: 0.0.40
codegen_flags: <defaults>
</compile_context>

<pallas_src>
import jax
import jax.numpy as jnp
from jax import lax
from jax.experimental import pallas as pl
from jax.experimental.pallas import tpu as pltpu


def decoder_kernel(ids_ref, emb_ref,
                   wir_ref, wiz_ref, win_ref,
                   whr_ref, whz_ref, whn_ref,
                   br_ref, bz_ref, bin_ref, bhn_ref,
                   h0_ref, enc_ref,
                   attn_ref, hidden_ref, rnn_ref):
    """Single-invocation kernel: embed + sequential GRU + fused dot attention.

    ids_ref   : (S*B, 1) i32   token ids, time-major rows (row = t*B + b)
    emb_ref   : (V, E)   f32   embedding table
    wi*_ref   : (H, E)   f32   per-gate input weights  (PyTorch [out, in])
    wh*_ref   : (H, H)   f32   per-gate hidden weights (PyTorch [out, in])
    br/bz_ref : (1, H)   f32   b_ir+b_hr / b_iz+b_hz (loop-invariant, folded)
    bin_ref   : (1, H)   f32   b_in
    bhn_ref   : (1, H)   f32   b_hn (must stay inside r * (.))
    h0_ref    : (B, H)   f32   initial hidden state
    enc_ref   : (S, B, H) f32  encoder outputs
    attn_ref  : (B, S)   f32   OUT: softmax over S (lane axis)
    hidden_ref: (B, H)   f32   OUT: final hidden state
    rnn_ref   : (S, B, H) f32  OUT: GRU outputs per step
    """
    SB = ids_ref.shape[0]
    V, _ = emb_ref.shape
    S, B, H = enc_ref.shape

    # ---- embedding lookup as a one-hot matmul (stays on MXU, no gather) ----
    ids = ids_ref[...]                                               # (S*B, 1)
    vocab = lax.broadcasted_iota(jnp.int32, (SB, V), 1)
    onehot = (ids == vocab).astype(jnp.float32)                      # (S*B, V)
    emb = jnp.dot(onehot, emb_ref[...],
                  preferred_element_type=jnp.float32)                # (S*B, E)
    # embedding_dropout: identity (eval mode)

    # ---- hoisted, loop-invariant input projections (one matmul per gate) ----
    dn = (((1,), (1,)), ((), ()))   # contract the "in" axis of (out, in) weights
    gi_r = lax.dot_general(emb, wir_ref[...], dn,
                           preferred_element_type=jnp.float32) + br_ref[...]
    gi_z = lax.dot_general(emb, wiz_ref[...], dn,
                           preferred_element_type=jnp.float32) + bz_ref[...]
    gi_n = lax.dot_general(emb, win_ref[...], dn,
                           preferred_element_type=jnp.float32) + bin_ref[...]

    whr = whr_ref[...]
    whz = whz_ref[...]
    whn = whn_ref[...]
    bhn = bhn_ref[...]

    lane_ids = lax.broadcasted_iota(jnp.int32, (B, S), 1)
    scores = jnp.zeros((B, S), jnp.float32)

    h = h0_ref[...]
    # Statically unrolled recurrence: only gh depends on h; per-step critical
    # path is three tiny MXU matmuls + EUP sigmoid/tanh + VPU blend.
    for t in range(S):
        lo = t * B
        gir_t = gi_r[lo:lo + B, :]
        giz_t = gi_z[lo:lo + B, :]
        gin_t = gi_n[lo:lo + B, :]

        gh_r = lax.dot_general(h, whr, dn, preferred_element_type=jnp.float32)
        gh_z = lax.dot_general(h, whz, dn, preferred_element_type=jnp.float32)
        gh_n = lax.dot_general(h, whn, dn, preferred_element_type=jnp.float32) + bhn

        r = jax.nn.sigmoid(gir_t + gh_r)
        z = jax.nn.sigmoid(giz_t + gh_z)
        n = jnp.tanh(gin_t + r * gh_n)
        h = (1.0 - z) * n + z * h                                    # (B, H)

        rnn_ref[t] = h
        # fused dot-attention score: rides in VPU/XLU slots between steps
        score_t = jnp.sum(h * enc_ref[t], axis=-1, keepdims=True)    # (B, 1)
        scores = jnp.where(lane_ids == t, score_t, scores)           # place col t

    hidden_ref[...] = h

    # softmax over the sequence (lane) axis -> (B, S), no wrapper transpose
    m = jnp.max(scores, axis=1, keepdims=True)
    e = jnp.exp(scores - m)
    attn_ref[...] = e / jnp.sum(e, axis=1, keepdims=True)


@jax.jit
def decoder_forward(decoder_inputs, last_hidden, encoder_outputs, params):
    """decoder_inputs: (B, S) int; last_hidden: (1, B, H); encoder_outputs: (S, B, H)."""
    emb_table = params["embedding"].astype(jnp.float32)              # (V, E)
    w_ih = params["w_ih"].astype(jnp.float32)                        # (3H, E), gates r,z,n
    w_hh = params["w_hh"].astype(jnp.float32)                        # (3H, H)
    b_ih = params["b_ih"].astype(jnp.float32)                        # (3H,)
    b_hh = params["b_hh"].astype(jnp.float32)                        # (3H,)

    B, S = decoder_inputs.shape
    H = w_hh.shape[1]

    # per-gate weight split (PyTorch gate order r, z, n), kept in stored layout
    w_ir, w_iz, w_in = w_ih[0:H], w_ih[H:2 * H], w_ih[2 * H:3 * H]   # (H, E)
    w_hr, w_hz, w_hn = w_hh[0:H], w_hh[H:2 * H], w_hh[2 * H:3 * H]   # (H, H)
    # fold loop-invariant biases (r/z gates); b_hn must stay inside r * (.)
    b_r = (b_ih[0:H] + b_hh[0:H]).reshape(1, H)
    b_z = (b_ih[H:2 * H] + b_hh[H:2 * H]).reshape(1, H)
    b_in = b_ih[2 * H:3 * H].reshape(1, H)
    b_hn = b_hh[2 * H:3 * H].reshape(1, H)

    # time-major token ids as a column: row index = t*B + b
    ids_col = decoder_inputs.astype(jnp.int32).T.reshape(S * B, 1)
    h0 = last_hidden[0].astype(jnp.float32)                          # (B, H)
    enc = encoder_outputs.astype(jnp.float32)                        # (S, B, H)

    vmem = pl.BlockSpec(memory_space=pltpu.MemorySpace.VMEM)
    attention, hidden, rnn_outs = pl.pallas_call(
        decoder_kernel,
        out_shape=(
            jax.ShapeDtypeStruct((B, S), jnp.float32),
            jax.ShapeDtypeStruct((B, H), jnp.float32),
            jax.ShapeDtypeStruct((S, B, H), jnp.float32),
        ),
        in_specs=[vmem] * 14,
        out_specs=(vmem, vmem, vmem),
    )(ids_col, emb_table, w_ir, w_iz, w_in, w_hr, w_hz, w_hn,
      b_r, b_z, b_in, b_hn, h0, enc)

    return attention, hidden.reshape(1, B, H), rnn_outs


def _ref_forward(decoder_inputs, last_hidden, encoder_outputs, params):
    """Pure-JAX reference matching PyTorch nn.GRU + dot attention semantics."""
    emb = jnp.take(params["embedding"], decoder_inputs, axis=0)      # (B, S, E)
    x = jnp.transpose(emb, (1, 0, 2))                                # (S, B, E)
    w_ih, w_hh = params["w_ih"], params["w_hh"]
    b_ih, b_hh = params["b_ih"], params["b_hh"]
    H = w_hh.shape[1]
    h = last_hidden[0]
    outs = []
    for t in range(x.shape[0]):
        gi = x[t] @ w_ih.T + b_ih
        gh = h @ w_hh.T + b_hh
        r = jax.nn.sigmoid(gi[:, 0:H] + gh[:, 0:H])
        z = jax.nn.sigmoid(gi[:, H:2 * H] + gh[:, H:2 * H])
        n = jnp.tanh(gi[:, 2 * H:] + r * gh[:, 2 * H:])
        h = (1.0 - z) * n + z * h
        outs.append(h)
    rnn = jnp.stack(outs, axis=0)                                    # (S, B, H)
    scores = jnp.sum(rnn * encoder_outputs, axis=2).T                # (B, S)
    attn = jax.nn.softmax(scores, axis=1)
    return attn, h[None], rnn


if __name__ == "__main__":
    # cfg: vocab_len=50, embedding_size=32, gru_hidden_size=32,
    #      gru_layers=1, bidirection=False
    V, E, H = 50, 32, 32
    B, S = 2, 8

    key = jax.random.PRNGKey(0)
    k_emb, k_wih, k_whh, k_bih, k_bhh, k_in, k_h0, k_enc = jax.random.split(key, 8)

    params = {
        "embedding": jax.random.normal(k_emb, (V, E), jnp.float32) * 0.1,
        "w_ih": jax.random.normal(k_wih, (3 * H, E), jnp.float32) * 0.1,  # gates r,z,n
        "w_hh": jax.random.normal(k_whh, (3 * H, H), jnp.float32) * 0.1,
        "b_ih": jax.random.normal(k_bih, (3 * H,), jnp.float32) * 0.1,
        "b_hh": jax.random.normal(k_bhh, (3 * H,), jnp.float32) * 0.1,
    }

    decoder_inputs = jax.random.randint(k_in, (B, S), 0, V, dtype=jnp.int32)
    last_hidden = jax.random.normal(k_h0, (1, B, H), jnp.float32) * 0.1
    encoder_outputs = jax.random.normal(k_enc, (S, B, H), jnp.float32) * 0.1

    attention, hidden, rnn_outs = decoder_forward(
        decoder_inputs, last_hidden, encoder_outputs, params)
    jax.block_until_ready((attention, hidden, rnn_outs))

    assert attention.shape == (B, S)
    assert hidden.shape == (1, B, H)
    assert rnn_outs.shape == (S, B, H)
    # softmax rows sum to 1
    assert jnp.allclose(jnp.sum(attention, axis=1), 1.0, atol=1e-5)

    # numerical parity with a pure-JAX reference of the PyTorch forward
    ref_attn, ref_hidden, ref_rnn = _ref_forward(
        decoder_inputs, last_hidden, encoder_outputs, params)
    assert jnp.allclose(attention, ref_attn, atol=2e-3)
    assert jnp.allclose(hidden, ref_hidden, atol=2e-3)
    assert jnp.allclose(rnn_outs, ref_rnn, atol=2e-3)

    print("KERNEL_OK")
</pallas_src>

<mosaic_0001>
module attributes {stable_mosaic.version = 11 : i64} {
  func.func @decoder_kernel(%arg0: memref<16x1xi32, #tpu.memory_space<vmem>>, %arg1: memref<50x32xf32, #tpu.memory_space<vmem>>, %arg2: memref<32x32xf32, #tpu.memory_space<vmem>>, %arg3: memref<32x32xf32, #tpu.memory_space<vmem>>, %arg4: memref<32x32xf32, #tpu.memory_space<vmem>>, %arg5: memref<32x32xf32, #tpu.memory_space<vmem>>, %arg6: memref<32x32xf32, #tpu.memory_space<vmem>>, %arg7: memref<32x32xf32, #tpu.memory_space<vmem>>, %arg8: memref<1x32xf32, #tpu.memory_space<vmem>>, %arg9: memref<1x32xf32, #tpu.memory_space<vmem>>, %arg10: memref<1x32xf32, #tpu.memory_space<vmem>>, %arg11: memref<1x32xf32, #tpu.memory_space<vmem>>, %arg12: memref<2x32xf32, #tpu.memory_space<vmem>>, %arg13: memref<8x2x32xf32, #tpu.memory_space<vmem>>, %arg14: memref<2x8xf32, #tpu.memory_space<vmem>>, %arg15: memref<2x32xf32, #tpu.memory_space<vmem>>, %arg16: memref<8x2x32xf32, #tpu.memory_space<vmem>>) attributes {dimension_semantics = [], scalar_prefetch = 0 : i64, scratch_operands = 0 : i64, tpu.core_type = #tpu.core_type<tc>} {
    %c0 = arith.constant 0 : index
    %c0_0 = arith.constant 0 : index
    %0 = vector.load %arg0[%c0, %c0_0] : memref<16x1xi32, #tpu.memory_space<vmem>>, vector<16x1xi32>
    %1 = tpu.iota {dimensions = array<i32: 1>} : vector<16x50xi32>
    %2 = vector.broadcast %0 : vector<16x1xi32> to vector<16x50xi32>
    %3 = arith.cmpi eq, %2, %1 : vector<16x50xi32>
    %4 = arith.extui %3 : vector<16x50xi1> to vector<16x50xi32>
    %5 = arith.sitofp %4 : vector<16x50xi32> to vector<16x50xf32>
    %c0_1 = arith.constant 0 : index
    %c0_2 = arith.constant 0 : index
    %6 = vector.load %arg1[%c0_1, %c0_2] : memref<50x32xf32, #tpu.memory_space<vmem>>, vector<50x32xf32>
    %cst = arith.constant dense<0.000000e+00> : vector<16x32xf32>
    %7 = tpu.matmul %5, %6, %cst {dimension_numbers = #tpu.dot_dimension_numbers<[1], [0], [0], [1], [0, 0, 1, 1], [], []>} : vector<16x50xf32>, vector<50x32xf32>, vector<16x32xf32> -> vector<16x32xf32>
    %c0_3 = arith.constant 0 : index
    %c0_4 = arith.constant 0 : index
    %8 = vector.load %arg2[%c0_3, %c0_4] : memref<32x32xf32, #tpu.memory_space<vmem>>, vector<32x32xf32>
    %cst_5 = arith.constant dense<0.000000e+00> : vector<16x32xf32>
    %9 = tpu.matmul %7, %8, %cst_5 {dimension_numbers = #tpu.dot_dimension_numbers<[1], [1], [0], [0], [0, 0, 1, 0], [], []>} : vector<16x32xf32>, vector<32x32xf32>, vector<16x32xf32> -> vector<16x32xf32>
    %c0_6 = arith.constant 0 : index
    %c0_7 = arith.constant 0 : index
    %10 = vector.load %arg8[%c0_6, %c0_7] : memref<1x32xf32, #tpu.memory_space<vmem>>, vector<1x32xf32>
    %11 = vector.broadcast %10 : vector<1x32xf32> to vector<16x32xf32>
    %12 = arith.addf %9, %11 : vector<16x32xf32>
    %c0_8 = arith.constant 0 : index
    %c0_9 = arith.constant 0 : index
    %13 = vector.load %arg3[%c0_8, %c0_9] : memref<32x32xf32, #tpu.memory_space<vmem>>, vector<32x32xf32>
    %cst_10 = arith.constant dense<0.000000e+00> : vector<16x32xf32>
    %14 = tpu.matmul %7, %13, %cst_10 {dimension_numbers = #tpu.dot_dimension_numbers<[1], [1], [0], [0], [0, 0, 1, 0], [], []>} : vector<16x32xf32>, vector<32x32xf32>, vector<16x32xf32> -> vector<16x32xf32>
    %c0_11 = arith.constant 0 : index
    %c0_12 = arith.constant 0 : index
    %15 = vector.load %arg9[%c0_11, %c0_12] : memref<1x32xf32, #tpu.memory_space<vmem>>, vector<1x32xf32>
    %16 = vector.broadcast %15 : vector<1x32xf32> to vector<16x32xf32>
    %17 = arith.addf %14, %16 : vector<16x32xf32>
    %c0_13 = arith.constant 0 : index
    %c0_14 = arith.constant 0 : index
    %18 = vector.load %arg4[%c0_13, %c0_14] : memref<32x32xf32, #tpu.memory_space<vmem>>, vector<32x32xf32>
    %cst_15 = arith.constant dense<0.000000e+00> : vector<16x32xf32>
    %19 = tpu.matmul %7, %18, %cst_15 {dimension_numbers = #tpu.dot_dimension_numbers<[1], [1], [0], [0], [0, 0, 1, 0], [], []>} : vector<16x32xf32>, vector<32x32xf32>, vector<16x32xf32> -> vector<16x32xf32>
    %c0_16 = arith.constant 0 : index
    %c0_17 = arith.constant 0 : index
    %20 = vector.load %arg10[%c0_16, %c0_17] : memref<1x32xf32, #tpu.memory_space<vmem>>, vector<1x32xf32>
    %21 = vector.broadcast %20 : vector<1x32xf32> to vector<16x32xf32>
    %22 = arith.addf %19, %21 : vector<16x32xf32>
    %c0_18 = arith.constant 0 : index
    %c0_19 = arith.constant 0 : index
    %23 = vector.load %arg5[%c0_18, %c0_19] : memref<32x32xf32, #tpu.memory_space<vmem>>, vector<32x32xf32>
    %c0_20 = arith.constant 0 : index
    %c0_21 = arith.constant 0 : index
    %24 = vector.load %arg6[%c0_20, %c0_21] : memref<32x32xf32, #tpu.memory_space<vmem>>, vector<32x32xf32>
    %c0_22 = arith.constant 0 : index
    %c0_23 = arith.constant 0 : index
    %25 = vector.load %arg7[%c0_22, %c0_23] : memref<32x32xf32, #tpu.memory_space<vmem>>, vector<32x32xf32>
    %c0_24 = arith.constant 0 : index
    %c0_25 = arith.constant 0 : index
    %26 = vector.load %arg11[%c0_24, %c0_25] : memref<1x32xf32, #tpu.memory_space<vmem>>, vector<1x32xf32>
    %27 = tpu.iota {dimensions = array<i32: 1>} : vector<2x8xi32>
    %cst_26 = arith.constant 0.000000e+00 : f32
    %28 = vector.broadcast %cst_26 : f32 to vector<2x8xf32>
    %c0_27 = arith.constant 0 : index
    %c0_28 = arith.constant 0 : index
    %29 = vector.load %arg12[%c0_27, %c0_28] : memref<2x32xf32, #tpu.memory_space<vmem>>, vector<2x32xf32>
    %30 = vector.extract_strided_slice %12 {offsets = [0, 0], sizes = [2, 32], strides = [1, 1]} : vector<16x32xf32> to vector<2x32xf32>
    %31 = vector.extract_strided_slice %17 {offsets = [0, 0], sizes = [2, 32], strides = [1, 1]} : vector<16x32xf32> to vector<2x32xf32>
    %32 = vector.extract_strided_slice %22 {offsets = [0, 0], sizes = [2, 32], strides = [1, 1]} : vector<16x32xf32> to vector<2x32xf32>
    %cst_29 = arith.constant dense<0.000000e+00> : vector<2x32xf32>
    %33 = tpu.matmul %29, %23, %cst_29 {dimension_numbers = #tpu.dot_dimension_numbers<[1], [1], [0], [0], [0, 0, 1, 0], [], []>} : vector<2x32xf32>, vector<32x32xf32>, vector<2x32xf32> -> vector<2x32xf32>
    %cst_30 = arith.constant dense<0.000000e+00> : vector<2x32xf32>
    %34 = tpu.matmul %29, %24, %cst_30 {dimension_numbers = #tpu.dot_dimension_numbers<[1], [1], [0], [0], [0, 0, 1, 0], [], []>} : vector<2x32xf32>, vector<32x32xf32>, vector<2x32xf32> -> vector<2x32xf32>
    %cst_31 = arith.constant dense<0.000000e+00> : vector<2x32xf32>
    %35 = tpu.matmul %29, %25, %cst_31 {dimension_numbers = #tpu.dot_dimension_numbers<[1], [1], [0], [0], [0, 0, 1, 0], [], []>} : vector<2x32xf32>, vector<32x32xf32>, vector<2x32xf32> -> vector<2x32xf32>
    %36 = vector.broadcast %26 : vector<1x32xf32> to vector<2x32xf32>
    %37 = arith.addf %35, %36 : vector<2x32xf32>
    %38 = arith.addf %30, %33 : vector<2x32xf32>
    %39 = arith.negf %38 : vector<2x32xf32>
    %40 = math.exp %39 : vector<2x32xf32>
    %cst_32 = arith.constant 1.000000e+00 : f32
    %41 = vector.broadcast %cst_32 : f32 to vector<2x32xf32>
    %42 = arith.addf %41, %40 : vector<2x32xf32>
    %43 = arith.divf %41, %42 : vector<2x32xf32>
    %44 = arith.addf %31, %34 : vector<2x32xf32>
    %45 = arith.negf %44 : vector<2x32xf32>
    %46 = math.exp %45 : vector<2x32xf32>
    %cst_33 = arith.constant 1.000000e+00 : f32
    %47 = vector.broadcast %cst_33 : f32 to vector<2x32xf32>
    %48 = arith.addf %47, %46 : vector<2x32xf32>
    %49 = arith.divf %47, %48 : vector<2x32xf32>
    %50 = arith.mulf %43, %37 : vector<2x32xf32>
    %51 = arith.addf %32, %50 : vector<2x32xf32>
    %52 = math.tanh %51 : vector<2x32xf32>
    %cst_34 = arith.constant 1.000000e+00 : f32
    %53 = vector.broadcast %cst_34 : f32 to vector<2x32xf32>
    %54 = arith.subf %53, %49 : vector<2x32xf32>
    %55 = arith.mulf %54, %52 : vector<2x32xf32>
    %56 = arith.mulf %49, %29 : vector<2x32xf32>
    %57 = arith.addf %55, %56 : vector<2x32xf32>
    %c0_35 = arith.constant 0 : index
    %c0_36 = arith.constant 0 : index
    %c0_37 = arith.constant 0 : index
    %58 = vector.load %arg16[%c0_35, %c0_36, %c0_37] : memref<8x2x32xf32, #tpu.memory_space<vmem>>, vector<1x2x32xf32>
    %59 = vector.shape_cast %58 : vector<1x2x32xf32> to vector<2x32xf32>
    %60 = vector.shape_cast %57 : vector<2x32xf32> to vector<1x2x32xf32>
    tpu.vector_store %arg16[%c0_35, %c0_36, %c0_37], %60 {strides = array<i32>} : memref<8x2x32xf32, #tpu.memory_space<vmem>>, vector<1x2x32xf32>,
    %c0_38 = arith.constant 0 : index
    %c0_39 = arith.constant 0 : index
    %c0_40 = arith.constant 0 : index
    %61 = vector.load %arg13[%c0_38, %c0_39, %c0_40] : memref<8x2x32xf32, #tpu.memory_space<vmem>>, vector<1x2x32xf32>
    %62 = vector.shape_cast %61 : vector<1x2x32xf32> to vector<2x32xf32>
    %63 = arith.mulf %57, %62 : vector<2x32xf32>
    %cst_41 = arith.constant dense<0.000000e+00> : vector<2xf32>
    %64 = vector.multi_reduction <add>, %63, %cst_41 [1] : vector<2x32xf32> to vector<2xf32>
    %65 = vector.shape_cast %64 : vector<2xf32> to vector<2x1xf32>
    %c0_i32 = arith.constant 0 : i32
    %66 = vector.broadcast %c0_i32 : i32 to vector<2x8xi32>
    %67 = arith.cmpi eq, %27, %66 : vector<2x8xi32>
    %68 = vector.shape_cast %65 : vector<2x1xf32> to vector<2x1xf32>
    %69 = vector.broadcast %68 : vector<2x1xf32> to vector<2x8xf32>
    %70 = arith.select %67, %69, %28 : vector<2x8xi1>, vector<2x8xf32>
    %71 = vector.extract_strided_slice %12 {offsets = [2, 0], sizes = [2, 32], strides = [1, 1]} : vector<16x32xf32> to vector<2x32xf32>
    %72 = vector.extract_strided_slice %17 {offsets = [2, 0], sizes = [2, 32], strides = [1, 1]} : vector<16x32xf32> to vector<2x32xf32>
    %73 = vector.extract_strided_slice %22 {offsets = [2, 0], sizes = [2, 32], strides = [1, 1]} : vector<16x32xf32> to vector<2x32xf32>
    %cst_42 = arith.constant dense<0.000000e+00> : vector<2x32xf32>
    %74 = tpu.matmul %57, %23, %cst_42 {dimension_numbers = #tpu.dot_dimension_numbers<[1], [1], [0], [0], [0, 0, 1, 0], [], []>} : vector<2x32xf32>, vector<32x32xf32>, vector<2x32xf32> -> vector<2x32xf32>
    %cst_43 = arith.constant dense<0.000000e+00> : vector<2x32xf32>
    %75 = tpu.matmul %57, %24, %cst_43 {dimension_numbers = #tpu.dot_dimension_numbers<[1], [1], [0], [0], [0, 0, 1, 0], [], []>} : vector<2x32xf32>, vector<32x32xf32>, vector<2x32xf32> -> vector<2x32xf32>
    %cst_44 = arith.constant dense<0.000000e+00> : vector<2x32xf32>
    %76 = tpu.matmul %57, %25, %cst_44 {dimension_numbers = #tpu.dot_dimension_numbers<[1], [1], [0], [0], [0, 0, 1, 0], [], []>} : vector<2x32xf32>, vector<32x32xf32>, vector<2x32xf32> -> vector<2x32xf32>
    %77 = vector.broadcast %26 : vector<1x32xf32> to vector<2x32xf32>
    %78 = arith.addf %76, %77 : vector<2x32xf32>
    %79 = arith.addf %71, %74 : vector<2x32xf32>
    %80 = arith.negf %79 : vector<2x32xf32>
    %81 = math.exp %80 : vector<2x32xf32>
    %cst_45 = arith.constant 1.000000e+00 : f32
    %82 = vector.broadcast %cst_45 : f32 to vector<2x32xf32>
    %83 = arith.addf %82, %81 : vector<2x32xf32>
    %84 = arith.divf %82, %83 : vector<2x32xf32>
    %85 = arith.addf %72, %75 : vector<2x32xf32>
    %86 = arith.negf %85 : vector<2x32xf32>
    %87 = math.exp %86 : vector<2x32xf32>
    %cst_46 = arith.constant 1.000000e+00 : f32
    %88 = vector.broadcast %cst_46 : f32 to vector<2x32xf32>
    %89 = arith.addf %88, %87 : vector<2x32xf32>
    %90 = arith.divf %88, %89 : vector<2x32xf32>
    %91 = arith.mulf %84, %78 : vector<2x32xf32>
    %92 = arith.addf %73, %91 : vector<2x32xf32>
    %93 = math.tanh %92 : vector<2x32xf32>
    %cst_47 = arith.constant 1.000000e+00 : f32
    %94 = vector.broadcast %cst_47 : f32 to vector<2x32xf32>
    %95 = arith.subf %94, %90 : vector<2x32xf32>
    %96 = arith.mulf %95, %93 : vector<2x32xf32>
    %97 = arith.mulf %90, %57 : vector<2x32xf32>
    %98 = arith.addf %96, %97 : vector<2x32xf32>
    %c1 = arith.constant 1 : index
    %c0_48 = arith.constant 0 : index
    %c0_49 = arith.constant 0 : index
    %99 = vector.load %arg16[%c1, %c0_48, %c0_49] : memref<8x2x32xf32, #tpu.memory_space<vmem>>, vector<1x2x32xf32>
    %100 = vector.shape_cast %99 : vector<1x2x32xf32> to vector<2x32xf32>
    %101 = vector.shape_cast %98 : vector<2x32xf32> to vector<1x2x32xf32>
    tpu.vector_store %arg16[%c1, %c0_48, %c0_49], %101 {strides = array<i32>} : memref<8x2x32xf32, #tpu.memory_space<vmem>>, vector<1x2x32xf32>,
    %c1_50 = arith.constant 1 : index
    %c0_51 = arith.constant 0 : index
    %c0_52 = arith.constant 0 : index
    %102 = vector.load %arg13[%c1_50, %c0_51, %c0_52] : memref<8x2x32xf32, #tpu.memory_space<vmem>>, vector<1x2x32xf32>
    %103 = vector.shape_cast %102 : vector<1x2x32xf32> to vector<2x32xf32>
    %104 = arith.mulf %98, %103 : vector<2x32xf32>
    %cst_53 = arith.constant dense<0.000000e+00> : vector<2xf32>
    %105 = vector.multi_reduction <add>, %104, %cst_53 [1] : vector<2x32xf32> to vector<2xf32>
    %106 = vector.shape_cast %105 : vector<2xf32> to vector<2x1xf32>
    %c1_i32 = arith.constant 1 : i32
    %107 = vector.broadcast %c1_i32 : i32 to vector<2x8xi32>
    %108 = arith.cmpi eq, %27, %107 : vector<2x8xi32>
    %109 = vector.shape_cast %106 : vector<2x1xf32> to vector<2x1xf32>
    %110 = vector.broadcast %109 : vector<2x1xf32> to vector<2x8xf32>
    %111 = arith.select %108, %110, %70 : vector<2x8xi1>, vector<2x8xf32>
    %112 = vector.extract_strided_slice %12 {offsets = [4, 0], sizes = [2, 32], strides = [1, 1]} : vector<16x32xf32> to vector<2x32xf32>
    %113 = vector.extract_strided_slice %17 {offsets = [4, 0], sizes = [2, 32], strides = [1, 1]} : vector<16x32xf32> to vector<2x32xf32>
    %114 = vector.extract_strided_slice %22 {offsets = [4, 0], sizes = [2, 32], strides = [1, 1]} : vector<16x32xf32> to vector<2x32xf32>
    %cst_54 = arith.constant dense<0.000000e+00> : vector<2x32xf32>
    %115 = tpu.matmul %98, %23, %cst_54 {dimension_numbers = #tpu.dot_dimension_numbers<[1], [1], [0], [0], [0, 0, 1, 0], [], []>} : vector<2x32xf32>, vector<32x32xf32>, vector<2x32xf32> -> vector<2x32xf32>
    %cst_55 = arith.constant dense<0.000000e+00> : vector<2x32xf32>
    %116 = tpu.matmul %98, %24, %cst_55 {dimension_numbers = #tpu.dot_dimension_numbers<[1], [1], [0], [0], [0, 0, 1, 0], [], []>} : vector<2x32xf32>, vector<32x32xf32>, vector<2x32xf32> -> vector<2x32xf32>
    %cst_56 = arith.constant dense<0.000000e+00> : vector<2x32xf32>
    %117 = tpu.matmul %98, %25, %cst_56 {dimension_numbers = #tpu.dot_dimension_numbers<[1], [1], [0], [0], [0, 0, 1, 0], [], []>} : vector<2x32xf32>, vector<32x32xf32>, vector<2x32xf32> -> vector<2x32xf32>
    %118 = vector.broadcast %26 : vector<1x32xf32> to vector<2x32xf32>
    %119 = arith.addf %117, %118 : vector<2x32xf32>
    %120 = arith.addf %112, %115 : vector<2x32xf32>
    %121 = arith.negf %120 : vector<2x32xf32>
    %122 = math.exp %121 : vector<2x32xf32>
    %cst_57 = arith.constant 1.000000e+00 : f32
    %123 = vector.broadcast %cst_57 : f32 to vector<2x32xf32>
    %124 = arith.addf %123, %122 : vector<2x32xf32>
    %125 = arith.divf %123, %124 : vector<2x32xf32>
    %126 = arith.addf %113, %116 : vector<2x32xf32>
    %127 = arith.negf %126 : vector<2x32xf32>
    %128 = math.exp %127 : vector<2x32xf32>
    %cst_58 = arith.constant 1.000000e+00 : f32
    %129 = vector.broadcast %cst_58 : f32 to vector<2x32xf32>
    %130 = arith.addf %129, %128 : vector<2x32xf32>
    %131 = arith.divf %129, %130 : vector<2x32xf32>
    %132 = arith.mulf %125, %119 : vector<2x32xf32>
    %133 = arith.addf %114, %132 : vector<2x32xf32>
    %134 = math.tanh %133 : vector<2x32xf32>
    %cst_59 = arith.constant 1.000000e+00 : f32
    %135 = vector.broadcast %cst_59 : f32 to vector<2x32xf32>
    %136 = arith.subf %135, %131 : vector<2x32xf32>
    %137 = arith.mulf %136, %134 : vector<2x32xf32>
    %138 = arith.mulf %131, %98 : vector<2x32xf32>
    %139 = arith.addf %137, %138 : vector<2x32xf32>
    %c2 = arith.constant 2 : index
    %c0_60 = arith.constant 0 : index
    %c0_61 = arith.constant 0 : index
    %140 = vector.load %arg16[%c2, %c0_60, %c0_61] : memref<8x2x32xf32, #tpu.memory_space<vmem>>, vector<1x2x32xf32>
    %141 = vector.shape_cast %140 : vector<1x2x32xf32> to vector<2x32xf32>
    %142 = vector.shape_cast %139 : vector<2x32xf32> to vector<1x2x32xf32>
    tpu.vector_store %arg16[%c2, %c0_60, %c0_61], %142 {strides = array<i32>} : memref<8x2x32xf32, #tpu.memory_space<vmem>>, vector<1x2x32xf32>,
    %c2_62 = arith.constant 2 : index
    %c0_63 = arith.constant 0 : index
    %c0_64 = arith.constant 0 : index
    %143 = vector.load %arg13[%c2_62, %c0_63, %c0_64] : memref<8x2x32xf32, #tpu.memory_space<vmem>>, vector<1x2x32xf32>
    %144 = vector.shape_cast %143 : vector<1x2x32xf32> to vector<2x32xf32>
    %145 = arith.mulf %139, %144 : vector<2x32xf32>
    %cst_65 = arith.constant dense<0.000000e+00> : vector<2xf32>
    %146 = vector.multi_reduction <add>, %145, %cst_65 [1] : vector<2x32xf32> to vector<2xf32>
    %147 = vector.shape_cast %146 : vector<2xf32> to vector<2x1xf32>
    %c2_i32 = arith.constant 2 : i32
    %148 = vector.broadcast %c2_i32 : i32 to vector<2x8xi32>
    %149 = arith.cmpi eq, %27, %148 : vector<2x8xi32>
    %150 = vector.shape_cast %147 : vector<2x1xf32> to vector<2x1xf32>
    %151 = vector.broadcast %150 : vector<2x1xf32> to vector<2x8xf32>
    %152 = arith.select %149, %151, %111 : vector<2x8xi1>, vector<2x8xf32>
    %153 = vector.extract_strided_slice %12 {offsets = [6, 0], sizes = [2, 32], strides = [1, 1]} : vector<16x32xf32> to vector<2x32xf32>
    %154 = vector.extract_strided_slice %17 {offsets = [6, 0], sizes = [2, 32], strides = [1, 1]} : vector<16x32xf32> to vector<2x32xf32>
    %155 = vector.extract_strided_slice %22 {offsets = [6, 0], sizes = [2, 32], strides = [1, 1]} : vector<16x32xf32> to vector<2x32xf32>
    %cst_66 = arith.constant dense<0.000000e+00> : vector<2x32xf32>
    %156 = tpu.matmul %139, %23, %cst_66 {dimension_numbers = #tpu.dot_dimension_numbers<[1], [1], [0], [0], [0, 0, 1, 0], [], []>} : vector<2x32xf32>, vector<32x32xf32>, vector<2x32xf32> -> vector<2x32xf32>
    %cst_67 = arith.constant dense<0.000000e+00> : vector<2x32xf32>
    %157 = tpu.matmul %139, %24, %cst_67 {dimension_numbers = #tpu.dot_dimension_numbers<[1], [1], [0], [0], [0, 0, 1, 0], [], []>} : vector<2x32xf32>, vector<32x32xf32>, vector<2x32xf32> -> vector<2x32xf32>
    %cst_68 = arith.constant dense<0.000000e+00> : vector<2x32xf32>
    %158 = tpu.matmul %139, %25, %cst_68 {dimension_numbers = #tpu.dot_dimension_numbers<[1], [1], [0], [0], [0, 0, 1, 0], [], []>} : vector<2x32xf32>, vector<32x32xf32>, vector<2x32xf32> -> vector<2x32xf32>
    %159 = vector.broadcast %26 : vector<1x32xf32> to vector<2x32xf32>
    %160 = arith.addf %158, %159 : vector<2x32xf32>
    %161 = arith.addf %153, %156 : vector<2x32xf32>
    %162 = arith.negf %161 : vector<2x32xf32>
    %163 = math.exp %162 : vector<2x32xf32>
    %cst_69 = arith.constant 1.000000e+00 : f32
    %164 = vector.broadcast %cst_69 : f32 to vector<2x32xf32>
    %165 = arith.addf %164, %163 : vector<2x32xf32>
    %166 = arith.divf %164, %165 : vector<2x32xf32>
    %167 = arith.addf %154, %157 : vector<2x32xf32>
    %168 = arith.negf %167 : vector<2x32xf32>
    %169 = math.exp %168 : vector<2x32xf32>
    %cst_70 = arith.constant 1.000000e+00 : f32
    %170 = vector.broadcast %cst_70 : f32 to vector<2x32xf32>
    %171 = arith.addf %170, %169 : vector<2x32xf32>
    %172 = arith.divf %170, %171 : vector<2x32xf32>
    %173 = arith.mulf %166, %160 : vector<2x32xf32>
    %174 = arith.addf %155, %173 : vector<2x32xf32>
    %175 = math.tanh %174 : vector<2x32xf32>
    %cst_71 = arith.constant 1.000000e+00 : f32
    %176 = vector.broadcast %cst_71 : f32 to vector<2x32xf32>
    %177 = arith.subf %176, %172 : vector<2x32xf32>
    %178 = arith.mulf %177, %175 : vector<2x32xf32>
    %179 = arith.mulf %172, %139 : vector<2x32xf32>
    %180 = arith.addf %178, %179 : vector<2x32xf32>
    %c3 = arith.constant 3 : index
    %c0_72 = arith.constant 0 : index
    %c0_73 = arith.constant 0 : index
    %181 = vector.load %arg16[%c3, %c0_72, %c0_73] : memref<8x2x32xf32, #tpu.memory_space<vmem>>, vector<1x2x32xf32>
    %182 = vector.shape_cast %181 : vector<1x2x32xf32> to vector<2x32xf32>
    %183 = vector.shape_cast %180 : vector<2x32xf32> to vector<1x2x32xf32>
    tpu.vector_store %arg16[%c3, %c0_72, %c0_73], %183 {strides = array<i32>} : memref<8x2x32xf32, #tpu.memory_space<vmem>>, vector<1x2x32xf32>,
    %c3_74 = arith.constant 3 : index
    %c0_75 = arith.constant 0 : index
    %c0_76 = arith.constant 0 : index
    %184 = vector.load %arg13[%c3_74, %c0_75, %c0_76] : memref<8x2x32xf32, #tpu.memory_space<vmem>>, vector<1x2x32xf32>
    %185 = vector.shape_cast %184 : vector<1x2x32xf32> to vector<2x32xf32>
    %186 = arith.mulf %180, %185 : vector<2x32xf32>
    %cst_77 = arith.constant dense<0.000000e+00> : vector<2xf32>
    %187 = vector.multi_reduction <add>, %186, %cst_77 [1] : vector<2x32xf32> to vector<2xf32>
    %188 = vector.shape_cast %187 : vector<2xf32> to vector<2x1xf32>
    %c3_i32 = arith.constant 3 : i32
    %189 = vector.broadcast %c3_i32 : i32 to vector<2x8xi32>
    %190 = arith.cmpi eq, %27, %189 : vector<2x8xi32>
    %191 = vector.shape_cast %188 : vector<2x1xf32> to vector<2x1xf32>
    %192 = vector.broadcast %191 : vector<2x1xf32> to vector<2x8xf32>
    %193 = arith.select %190, %192, %152 : vector<2x8xi1>, vector<2x8xf32>
    %194 = vector.extract_strided_slice %12 {offsets = [8, 0], sizes = [2, 32], strides = [1, 1]} : vector<16x32xf32> to vector<2x32xf32>
    %195 = vector.extract_strided_slice %17 {offsets = [8, 0], sizes = [2, 32], strides = [1, 1]} : vector<16x32xf32> to vector<2x32xf32>
    %196 = vector.extract_strided_slice %22 {offsets = [8, 0], sizes = [2, 32], strides = [1, 1]} : vector<16x32xf32> to vector<2x32xf32>
    %cst_78 = arith.constant dense<0.000000e+00> : vector<2x32xf32>
    %197 = tpu.matmul %180, %23, %cst_78 {dimension_numbers = #tpu.dot_dimension_numbers<[1], [1], [0], [0], [0, 0, 1, 0], [], []>} : vector<2x32xf32>, vector<32x32xf32>, vector<2x32xf32> -> vector<2x32xf32>
    %cst_79 = arith.constant dense<0.000000e+00> : vector<2x32xf32>
    %198 = tpu.matmul %180, %24, %cst_79 {dimension_numbers = #tpu.dot_dimension_numbers<[1], [1], [0], [0], [0, 0, 1, 0], [], []>} : vector<2x32xf32>, vector<32x32xf32>, vector<2x32xf32> -> vector<2x32xf32>
    %cst_80 = arith.constant dense<0.000000e+00> : vector<2x32xf32>
    %199 = tpu.matmul %180, %25, %cst_80 {dimension_numbers = #tpu.dot_dimension_numbers<[1], [1], [0], [0], [0, 0, 1, 0], [], []>} : vector<2x32xf32>, vector<32x32xf32>, vector<2x32xf32> -> vector<2x32xf32>
    %200 = vector.broadcast %26 : vector<1x32xf32> to vector<2x32xf32>
    %201 = arith.addf %199, %200 : vector<2x32xf32>
    %202 = arith.addf %194, %197 : vector<2x32xf32>
    %203 = arith.negf %202 : vector<2x32xf32>
    %204 = math.exp %203 : vector<2x32xf32>
    %cst_81 = arith.constant 1.000000e+00 : f32
    %205 = vector.broadcast %cst_81 : f32 to vector<2x32xf32>
    %206 = arith.addf %205, %204 : vector<2x32xf32>
    %207 = arith.divf %205, %206 : vector<2x32xf32>
    %208 = arith.addf %195, %198 : vector<2x32xf32>
    %209 = arith.negf %208 : vector<2x32xf32>
    %210 = math.exp %209 : vector<2x32xf32>
    %cst_82 = arith.constant 1.000000e+00 : f32
    %211 = vector.broadcast %cst_82 : f32 to vector<2x32xf32>
    %212 = arith.addf %211, %210 : vector<2x32xf32>
    %213 = arith.divf %211, %212 : vector<2x32xf32>
    %214 = arith.mulf %207, %201 : vector<2x32xf32>
    %215 = arith.addf %196, %214 : vector<2x32xf32>
    %216 = math.tanh %215 : vector<2x32xf32>
    %cst_83 = arith.constant 1.000000e+00 : f32
    %217 = vector.broadcast %cst_83 : f32 to vector<2x32xf32>
    %218 = arith.subf %217, %213 : vector<2x32xf32>
    %219 = arith.mulf %218, %216 : vector<2x32xf32>
    %220 = arith.mulf %213, %180 : vector<2x32xf32>
    %221 = arith.addf %219, %220 : vector<2x32xf32>
    %c4 = arith.constant 4 : index
    %c0_84 = arith.constant 0 : index
    %c0_85 = arith.constant 0 : index
    %222 = vector.load %arg16[%c4, %c0_84, %c0_85] : memref<8x2x32xf32, #tpu.memory_space<vmem>>, vector<1x2x32xf32>
    %223 = vector.shape_cast %222 : vector<1x2x32xf32> to vector<2x32xf32>
    %224 = vector.shape_cast %221 : vector<2x32xf32> to vector<1x2x32xf32>
    tpu.vector_store %arg16[%c4, %c0_84, %c0_85], %224 {strides = array<i32>} : memref<8x2x32xf32, #tpu.memory_space<vmem>>, vector<1x2x32xf32>,
    %c4_86 = arith.constant 4 : index
    %c0_87 = arith.constant 0 : index
    %c0_88 = arith.constant 0 : index
    %225 = vector.load %arg13[%c4_86, %c0_87, %c0_88] : memref<8x2x32xf32, #tpu.memory_space<vmem>>, vector<1x2x32xf32>
    %226 = vector.shape_cast %225 : vector<1x2x32xf32> to vector<2x32xf32>
    %227 = arith.mulf %221, %226 : vector<2x32xf32>
    %cst_89 = arith.constant dense<0.000000e+00> : vector<2xf32>
    %228 = vector.multi_reduction <add>, %227, %cst_89 [1] : vector<2x32xf32> to vector<2xf32>
    %229 = vector.shape_cast %228 : vector<2xf32> to vector<2x1xf32>
    %c4_i32 = arith.constant 4 : i32
    %230 = vector.broadcast %c4_i32 : i32 to vector<2x8xi32>
    %231 = arith.cmpi eq, %27, %230 : vector<2x8xi32>
    %232 = vector.shape_cast %229 : vector<2x1xf32> to vector<2x1xf32>
    %233 = vector.broadcast %232 : vector<2x1xf32> to vector<2x8xf32>
    %234 = arith.select %231, %233, %193 : vector<2x8xi1>, vector<2x8xf32>
    %235 = vector.extract_strided_slice %12 {offsets = [10, 0], sizes = [2, 32], strides = [1, 1]} : vector<16x32xf32> to vector<2x32xf32>
    %236 = vector.extract_strided_slice %17 {offsets = [10, 0], sizes = [2, 32], strides = [1, 1]} : vector<16x32xf32> to vector<2x32xf32>
    %237 = vector.extract_strided_slice %22 {offsets = [10, 0], sizes = [2, 32], strides = [1, 1]} : vector<16x32xf32> to vector<2x32xf32>
    %cst_90 = arith.constant dense<0.000000e+00> : vector<2x32xf32>
    %238 = tpu.matmul %221, %23, %cst_90 {dimension_numbers = #tpu.dot_dimension_numbers<[1], [1], [0], [0], [0, 0, 1, 0], [], []>} : vector<2x32xf32>, vector<32x32xf32>, vector<2x32xf32> -> vector<2x32xf32>
    %cst_91 = arith.constant dense<0.000000e+00> : vector<2x32xf32>
    %239 = tpu.matmul %221, %24, %cst_91 {dimension_numbers = #tpu.dot_dimension_numbers<[1], [1], [0], [0], [0, 0, 1, 0], [], []>} : vector<2x32xf32>, vector<32x32xf32>, vector<2x32xf32> -> vector<2x32xf32>
    %cst_92 = arith.constant dense<0.000000e+00> : vector<2x32xf32>
    %240 = tpu.matmul %221, %25, %cst_92 {dimension_numbers = #tpu.dot_dimension_numbers<[1], [1], [0], [0], [0, 0, 1, 0], [], []>} : vector<2x32xf32>, vector<32x32xf32>, vector<2x32xf32> -> vector<2x32xf32>
    %241 = vector.broadcast %26 : vector<1x32xf32> to vector<2x32xf32>
    %242 = arith.addf %240, %241 : vector<2x32xf32>
    %243 = arith.addf %235, %238 : vector<2x32xf32>
    %244 = arith.negf %243 : vector<2x32xf32>
    %245 = math.exp %244 : vector<2x32xf32>
    %cst_93 = arith.constant 1.000000e+00 : f32
    %246 = vector.broadcast %cst_93 : f32 to vector<2x32xf32>
    %247 = arith.addf %246, %245 : vector<2x32xf32>
    %248 = arith.divf %246, %247 : vector<2x32xf32>
    %249 = arith.addf %236, %239 : vector<2x32xf32>
    %250 = arith.negf %249 : vector<2x32xf32>
    %251 = math.exp %250 : vector<2x32xf32>
    %cst_94 = arith.constant 1.000000e+00 : f32
    %252 = vector.broadcast %cst_94 : f32 to vector<2x32xf32>
    %253 = arith.addf %252, %251 : vector<2x32xf32>
    %254 = arith.divf %252, %253 : vector<2x32xf32>
    %255 = arith.mulf %248, %242 : vector<2x32xf32>
    %256 = arith.addf %237, %255 : vector<2x32xf32>
    %257 = math.tanh %256 : vector<2x32xf32>
    %cst_95 = arith.constant 1.000000e+00 : f32
    %258 = vector.broadcast %cst_95 : f32 to vector<2x32xf32>
    %259 = arith.subf %258, %254 : vector<2x32xf32>
    %260 = arith.mulf %259, %257 : vector<2x32xf32>
    %261 = arith.mulf %254, %221 : vector<2x32xf32>
    %262 = arith.addf %260, %261 : vector<2x32xf32>
    %c5 = arith.constant 5 : index
    %c0_96 = arith.constant 0 : index
    %c0_97 = arith.constant 0 : index
    %263 = vector.load %arg16[%c5, %c0_96, %c0_97] : memref<8x2x32xf32, #tpu.memory_space<vmem>>, vector<1x2x32xf32>
    %264 = vector.shape_cast %263 : vector<1x2x32xf32> to vector<2x32xf32>
    %265 = vector.shape_cast %262 : vector<2x32xf32> to vector<1x2x32xf32>
    tpu.vector_store %arg16[%c5, %c0_96, %c0_97], %265 {strides = array<i32>} : memref<8x2x32xf32, #tpu.memory_space<vmem>>, vector<1x2x32xf32>,
    %c5_98 = arith.constant 5 : index
    %c0_99 = arith.constant 0 : index
    %c0_100 = arith.constant 0 : index
    %266 = vector.load %arg13[%c5_98, %c0_99, %c0_100] : memref<8x2x32xf32, #tpu.memory_space<vmem>>, vector<1x2x32xf32>
    %267 = vector.shape_cast %266 : vector<1x2x32xf32> to vector<2x32xf32>
    %268 = arith.mulf %262, %267 : vector<2x32xf32>
    %cst_101 = arith.constant dense<0.000000e+00> : vector<2xf32>
    %269 = vector.multi_reduction <add>, %268, %cst_101 [1] : vector<2x32xf32> to vector<2xf32>
    %270 = vector.shape_cast %269 : vector<2xf32> to vector<2x1xf32>
    %c5_i32 = arith.constant 5 : i32
    %271 = vector.broadcast %c5_i32 : i32 to vector<2x8xi32>
    %272 = arith.cmpi eq, %27, %271 : vector<2x8xi32>
    %273 = vector.shape_cast %270 : vector<2x1xf32> to vector<2x1xf32>
    %274 = vector.broadcast %273 : vector<2x1xf32> to vector<2x8xf32>
    %275 = arith.select %272, %274, %234 : vector<2x8xi1>, vector<2x8xf32>
    %276 = vector.extract_strided_slice %12 {offsets = [12, 0], sizes = [2, 32], strides = [1, 1]} : vector<16x32xf32> to vector<2x32xf32>
    %277 = vector.extract_strided_slice %17 {offsets = [12, 0], sizes = [2, 32], strides = [1, 1]} : vector<16x32xf32> to vector<2x32xf32>
    %278 = vector.extract_strided_slice %22 {offsets = [12, 0], sizes = [2, 32], strides = [1, 1]} : vector<16x32xf32> to vector<2x32xf32>
    %cst_102 = arith.constant dense<0.000000e+00> : vector<2x32xf32>
    %279 = tpu.matmul %262, %23, %cst_102 {dimension_numbers = #tpu.dot_dimension_numbers<[1], [1], [0], [0], [0, 0, 1, 0], [], []>} : vector<2x32xf32>, vector<32x32xf32>, vector<2x32xf32> -> vector<2x32xf32>
    %cst_103 = arith.constant dense<0.000000e+00> : vector<2x32xf32>
    %280 = tpu.matmul %262, %24, %cst_103 {dimension_numbers = #tpu.dot_dimension_numbers<[1], [1], [0], [0], [0, 0, 1, 0], [], []>} : vector<2x32xf32>, vector<32x32xf32>, vector<2x32xf32> -> vector<2x32xf32>
    %cst_104 = arith.constant dense<0.000000e+00> : vector<2x32xf32>
    %281 = tpu.matmul %262, %25, %cst_104 {dimension_numbers = #tpu.dot_dimension_numbers<[1], [1], [0], [0], [0, 0, 1, 0], [], []>} : vector<2x32xf32>, vector<32x32xf32>, vector<2x32xf32> -> vector<2x32xf32>
    %282 = vector.broadcast %26 : vector<1x32xf32> to vector<2x32xf32>
    %283 = arith.addf %281, %282 : vector<2x32xf32>
    %284 = arith.addf %276, %279 : vector<2x32xf32>
    %285 = arith.negf %284 : vector<2x32xf32>
    %286 = math.exp %285 : vector<2x32xf32>
    %cst_105 = arith.constant 1.000000e+00 : f32
    %287 = vector.broadcast %cst_105 : f32 to vector<2x32xf32>
    %288 = arith.addf %287, %286 : vector<2x32xf32>
    %289 = arith.divf %287, %288 : vector<2x32xf32>
    %290 = arith.addf %277, %280 : vector<2x32xf32>
    %291 = arith.negf %290 : vector<2x32xf32>
    %292 = math.exp %291 : vector<2x32xf32>
    %cst_106 = arith.constant 1.000000e+00 : f32
    %293 = vector.broadcast %cst_106 : f32 to vector<2x32xf32>
    %294 = arith.addf %293, %292 : vector<2x32xf32>
    %295 = arith.divf %293, %294 : vector<2x32xf32>
    %296 = arith.mulf %289, %283 : vector<2x32xf32>
    %297 = arith.addf %278, %296 : vector<2x32xf32>
    %298 = math.tanh %297 : vector<2x32xf32>
    %cst_107 = arith.constant 1.000000e+00 : f32
    %299 = vector.broadcast %cst_107 : f32 to vector<2x32xf32>
    %300 = arith.subf %299, %295 : vector<2x32xf32>
    %301 = arith.mulf %300, %298 : vector<2x32xf32>
    %302 = arith.mulf %295, %262 : vector<2x32xf32>
    %303 = arith.addf %301, %302 : vector<2x32xf32>
    %c6 = arith.constant 6 : index
    %c0_108 = arith.constant 0 : index
    %c0_109 = arith.constant 0 : index
    %304 = vector.load %arg16[%c6, %c0_108, %c0_109] : memref<8x2x32xf32, #tpu.memory_space<vmem>>, vector<1x2x32xf32>
    %305 = vector.shape_cast %304 : vector<1x2x32xf32> to vector<2x32xf32>
    %306 = vector.shape_cast %303 : vector<2x32xf32> to vector<1x2x32xf32>
    tpu.vector_store %arg16[%c6, %c0_108, %c0_109], %306 {strides = array<i32>} : memref<8x2x32xf32, #tpu.memory_space<vmem>>, vector<1x2x32xf32>,
    %c6_110 = arith.constant 6 : index
    %c0_111 = arith.constant 0 : index
    %c0_112 = arith.constant 0 : index
    %307 = vector.load %arg13[%c6_110, %c0_111, %c0_112] : memref<8x2x32xf32, #tpu.memory_space<vmem>>, vector<1x2x32xf32>
    %308 = vector.shape_cast %307 : vector<1x2x32xf32> to vector<2x32xf32>
    %309 = arith.mulf %303, %308 : vector<2x32xf32>
    %cst_113 = arith.constant dense<0.000000e+00> : vector<2xf32>
    %310 = vector.multi_reduction <add>, %309, %cst_113 [1] : vector<2x32xf32> to vector<2xf32>
    %311 = vector.shape_cast %310 : vector<2xf32> to vector<2x1xf32>
    %c6_i32 = arith.constant 6 : i32
    %312 = vector.broadcast %c6_i32 : i32 to vector<2x8xi32>
    %313 = arith.cmpi eq, %27, %312 : vector<2x8xi32>
    %314 = vector.shape_cast %311 : vector<2x1xf32> to vector<2x1xf32>
    %315 = vector.broadcast %314 : vector<2x1xf32> to vector<2x8xf32>
    %316 = arith.select %313, %315, %275 : vector<2x8xi1>, vector<2x8xf32>
    %317 = vector.extract_strided_slice %12 {offsets = [14, 0], sizes = [2, 32], strides = [1, 1]} : vector<16x32xf32> to vector<2x32xf32>
    %318 = vector.extract_strided_slice %17 {offsets = [14, 0], sizes = [2, 32], strides = [1, 1]} : vector<16x32xf32> to vector<2x32xf32>
    %319 = vector.extract_strided_slice %22 {offsets = [14, 0], sizes = [2, 32], strides = [1, 1]} : vector<16x32xf32> to vector<2x32xf32>
    %cst_114 = arith.constant dense<0.000000e+00> : vector<2x32xf32>
    %320 = tpu.matmul %303, %23, %cst_114 {dimension_numbers = #tpu.dot_dimension_numbers<[1], [1], [0], [0], [0, 0, 1, 0], [], []>} : vector<2x32xf32>, vector<32x32xf32>, vector<2x32xf32> -> vector<2x32xf32>
    %cst_115 = arith.constant dense<0.000000e+00> : vector<2x32xf32>
    %321 = tpu.matmul %303, %24, %cst_115 {dimension_numbers = #tpu.dot_dimension_numbers<[1], [1], [0], [0], [0, 0, 1, 0], [], []>} : vector<2x32xf32>, vector<32x32xf32>, vector<2x32xf32> -> vector<2x32xf32>
    %cst_116 = arith.constant dense<0.000000e+00> : vector<2x32xf32>
    %322 = tpu.matmul %303, %25, %cst_116 {dimension_numbers = #tpu.dot_dimension_numbers<[1], [1], [0], [0], [0, 0, 1, 0], [], []>} : vector<2x32xf32>, vector<32x32xf32>, vector<2x32xf32> -> vector<2x32xf32>
    %323 = vector.broadcast %26 : vector<1x32xf32> to vector<2x32xf32>
    %324 = arith.addf %322, %323 : vector<2x32xf32>
    %325 = arith.addf %317, %320 : vector<2x32xf32>
    %326 = arith.negf %325 : vector<2x32xf32>
    %327 = math.exp %326 : vector<2x32xf32>
    %cst_117 = arith.constant 1.000000e+00 : f32
    %328 = vector.broadcast %cst_117 : f32 to vector<2x32xf32>
    %329 = arith.addf %328, %327 : vector<2x32xf32>
    %330 = arith.divf %328, %329 : vector<2x32xf32>
    %331 = arith.addf %318, %321 : vector<2x32xf32>
    %332 = arith.negf %331 : vector<2x32xf32>
    %333 = math.exp %332 : vector<2x32xf32>
    %cst_118 = arith.constant 1.000000e+00 : f32
    %334 = vector.broadcast %cst_118 : f32 to vector<2x32xf32>
    %335 = arith.addf %334, %333 : vector<2x32xf32>
    %336 = arith.divf %334, %335 : vector<2x32xf32>
    %337 = arith.mulf %330, %324 : vector<2x32xf32>
    %338 = arith.addf %319, %337 : vector<2x32xf32>
    %339 = math.tanh %338 : vector<2x32xf32>
    %cst_119 = arith.constant 1.000000e+00 : f32
    %340 = vector.broadcast %cst_119 : f32 to vector<2x32xf32>
    %341 = arith.subf %340, %336 : vector<2x32xf32>
    %342 = arith.mulf %341, %339 : vector<2x32xf32>
    %343 = arith.mulf %336, %303 : vector<2x32xf32>
    %344 = arith.addf %342, %343 : vector<2x32xf32>
    %c7 = arith.constant 7 : index
    %c0_120 = arith.constant 0 : index
    %c0_121 = arith.constant 0 : index
    %345 = vector.load %arg16[%c7, %c0_120, %c0_121] : memref<8x2x32xf32, #tpu.memory_space<vmem>>, vector<1x2x32xf32>
    %346 = vector.shape_cast %345 : vector<1x2x32xf32> to vector<2x32xf32>
    %347 = vector.shape_cast %344 : vector<2x32xf32> to vector<1x2x32xf32>
    tpu.vector_store %arg16[%c7, %c0_120, %c0_121], %347 {strides = array<i32>} : memref<8x2x32xf32, #tpu.memory_space<vmem>>, vector<1x2x32xf32>,
    %c7_122 = arith.constant 7 : index
    %c0_123 = arith.constant 0 : index
    %c0_124 = arith.constant 0 : index
    %348 = vector.load %arg13[%c7_122, %c0_123, %c0_124] : memref<8x2x32xf32, #tpu.memory_space<vmem>>, vector<1x2x32xf32>
    %349 = vector.shape_cast %348 : vector<1x2x32xf32> to vector<2x32xf32>
    %350 = arith.mulf %344, %349 : vector<2x32xf32>
    %cst_125 = arith.constant dense<0.000000e+00> : vector<2xf32>
    %351 = vector.multi_reduction <add>, %350, %cst_125 [1] : vector<2x32xf32> to vector<2xf32>
    %352 = vector.shape_cast %351 : vector<2xf32> to vector<2x1xf32>
    %c7_i32 = arith.constant 7 : i32
    %353 = vector.broadcast %c7_i32 : i32 to vector<2x8xi32>
    %354 = arith.cmpi eq, %27, %353 : vector<2x8xi32>
    %355 = vector.shape_cast %352 : vector<2x1xf32> to vector<2x1xf32>
    %356 = vector.broadcast %355 : vector<2x1xf32> to vector<2x8xf32>
    %357 = arith.select %354, %356, %316 : vector<2x8xi1>, vector<2x8xf32>
    %c0_126 = arith.constant 0 : index
    %c0_127 = arith.constant 0 : index
    %358 = vector.load %arg15[%c0_126, %c0_127] : memref<2x32xf32, #tpu.memory_space<vmem>>, vector<2x32xf32>
    tpu.vector_store %arg15[%c0_126, %c0_127], %344 {strides = array<i32>} : memref<2x32xf32, #tpu.memory_space<vmem>>, vector<2x32xf32>,
    %cst_128 = arith.constant dense<0xFF800000> : vector<2xf32>
    %359 = vector.multi_reduction <maximumf>, %357, %cst_128 [1] : vector<2x8xf32> to vector<2xf32>
    %360 = vector.shape_cast %359 : vector<2xf32> to vector<2x1xf32>
    %361 = vector.broadcast %360 : vector<2x1xf32> to vector<2x8xf32>
    %362 = arith.subf %357, %361 : vector<2x8xf32>
    %363 = math.exp %362 : vector<2x8xf32>
    %cst_129 = arith.constant dense<0.000000e+00> : vector<2xf32>
    %364 = vector.multi_reduction <add>, %363, %cst_129 [1] : vector<2x8xf32> to vector<2xf32>
    %365 = vector.shape_cast %364 : vector<2xf32> to vector<2x1xf32>
    %366 = vector.broadcast %365 : vector<2x1xf32> to vector<2x8xf32>
    %367 = arith.divf %363, %366 : vector<2x8xf32>
    %c0_130 = arith.constant 0 : index
    %c0_131 = arith.constant 0 : index
    %368 = vector.load %arg14[%c0_130, %c0_131] : memref<2x8xf32, #tpu.memory_space<vmem>>, vector<2x8xf32>
    tpu.vector_store %arg14[%c0_130, %c0_131], %367 {strides = array<i32>} : memref<2x8xf32, #tpu.memory_space<vmem>>, vector<2x8xf32>,
    return
  }
}

</mosaic_0001>

<bundles_post_ra>
// kernel: decoder_forward.1
= control target key start
LH: loop header
LB: loop body
LE: loop exit
PB: predicated region body
PF: predicated region fallthrough
CT: control target
= control target key end

     0   :  { %s2422_s0 = inlined_call_operand.vmem [shape: s32[16,1], index: 0, kind: input, shape index: {}]   ;;  %s2423_s1 = inlined_call_operand.vmem [shape: f32[50,32], index: 1, kind: input, shape index: {}]   ;;  %s2424_s2 = inlined_call_operand.vmem [shape: f32[32,32], index: 2, kind: input, shape index: {}]   ;;  %s2425_s3 = inlined_call_operand.vmem [shape: f32[32,32], index: 3, kind: input, shape index: {}]   ;;  %s2426_s4 = inlined_call_operand.vmem [shape: f32[32,32], index: 4, kind: input, shape index: {}]   ;;  %s2427_s5 = inlined_call_operand.vmem [shape: f32[32,32], index: 5, kind: input, shape index: {}]   ;;  %s2428_s6 = inlined_call_operand.vmem [shape: f32[32,32], index: 6, kind: input, shape index: {}]   ;;  %s2429_s7 = inlined_call_operand.vmem [shape: f32[32,32], index: 7, kind: input, shape index: {}]   ;;  %s2430_s8 = inlined_call_operand.vmem [shape: f32[1,32], index: 8, kind: input, shape index: {}]   ;;  %s2431_s9 = inlined_call_operand.vmem [shape: f32[1,32], index: 9, kind: input, shape index: {}]   ;;  %s2432_s10 = inlined_call_operand.vmem [shape: f32[1,32], index: 10, kind: input, shape index: {}]   ;;  %s2433_s11 = inlined_call_operand.vmem [shape: f32[1,32], index: 11, kind: input, shape index: {}]   ;;  %s2434_s12 = inlined_call_operand.vmem [shape: f32[2,32], index: 12, kind: input, shape index: {}]   ;;  %s2435_s13 = inlined_call_operand.vmem [shape: f32[8,2,32], index: 13, kind: input, shape index: {}]   ;;  %s2436_s14 = inlined_call_operand.hbm [shape: f32[2,8], index: 14, kind: output, shape index: {0}]   ;;  %s2437_s15 = inlined_call_operand.hbm [shape: f32[2,32], index: 15, kind: output, shape index: {1}]   ;;  %s2438_s16 = inlined_call_operand.hbm [shape: f32[8,2,32], index: 16, kind: output, shape index: {2}]  }
   0x1   :  { %2440 = sst [smem:[#allocation9_spill]] %s2422_s0 }
   0x2   :  { %22 = vsyncpa [#allocation3], 0  ;;  %s2441_s23 = sld [smem:[#allocation9_spill]]  ;;  %v74_v1 = vld [vmem:[%s2423_s1 + $0x30] sm:$0x3]  ;;  %vm82_vm0 = vcmask 1041408  }
   0x3   :  { %v1786_v2 = vmov 0   ;;  %1449 = vmatpush.msk.msra.mxu0 %vm82_vm0, %v74_v1  ;;  %v73_v3 = vld [vmem:[%s2423_s1 + $0x28] sm:$0xff]  ;;  %v72_v4 = vld [vmem:[%s2423_s1 + $0x20] sm:$0xff]  ;;  %v71_v5 = vld [vmem:[%s2423_s1 + $0x18] sm:$0xff] }
   0x4   :  { %1620 = vset.pattern.permute.xlu0 %v1786_v2 }
   0x5   :  { %96 = vmatpush.msra.mxu0 %v73_v3 }
   0x8   :  { %v52_v0 = vld [vmem:[%s2441_s23] sm:$0xff] }
   0x9   :  { %57 = vperm.xlu0 %1620, %v52_v0  }
   0xa   :  { %23 = vsyncpa [#allocation5], 0  ;;  %97 = vmatpush.msra.mxu0 %v72_v4  ;;  %v70_v6 = vld [vmem:[%s2423_s1 + $0x10] sm:$0xff]  ;;  %v53_v7 = vld [vmem:[%s2441_s23 + $0x8] sm:$0xff]  ;;  %vm117_vm1 = vcmask 261120   ;;  %v54_v25 = vlaneseq  ;;  %vm75_vm2 = vcmask 408576  }
   0xb   :  { %v69_v8 = vld [vmem:[%s2423_s1 + $0x8] sm:$0xff]  ;;  %v68_v9 = vld [vmem:[%s2423_s1] sm:$0xff]  ;;  %v112_v10 = vld [vmem:[%s2424_s2 + $0x18] sm:$0xff]  ;;  %v1787_v28 = vmov 0.0   ;;  %vm408_vm13 = vcmask 254976   ;;  %s1788_s21 = smov [#allocation4]  }
   0xc   :  { %98 = vmatpush.msra.mxu0 %v71_v5  ;;  %v162_v11 = vld [vmem:[%s2425_s3 + $0x18] sm:$0xff]  ;;  %1452 = vmatpush.xpose.msk.msra.mxu1 %vm117_vm1, %v112_v10  ;;  %v111_v14 = vld [vmem:[%s2424_s2 + $0x10] sm:$0xff]  ;;  %v110_v18 = vld [vmem:[%s2424_s2 + $0x8] sm:$0xff]  ;;  %v1976_v26 = vand.u32 127, %v54_v25  ;;  %s1414_s22 = sshll.u32 %s1788_s21, 4  ;;  %s1791_s24 = smov 2   ;;  %s1415_s22 = int_to_ptr.vmem [resolvable:$true] %s1414_s22 }
   0xd   :  { %v205_v12 = vld [vmem:[%s2426_s4 + $0x18] sm:$0xff]  ;;  %1458 = vmatpush.xpose.msk.msra.mxu2 %vm117_vm1, %v162_v11  ;;  %v161_v15 = vld [vmem:[%s2425_s3 + $0x10] sm:$0xff]  ;;  %v160_v19 = vld [vmem:[%s2425_s3 + $0x8] sm:$0xff] }
   0xe   :  { %99 = vmatpush.msra.mxu0 %v70_v6  ;;  %v1919_v13 = vld [vmem:[%s2427_s5 + $0x18] sm:$0xff]  ;;  %1464 = vmatpush.xpose.msk.msra.mxu3 %vm117_vm1, %v205_v12  ;;  %v204_v16 = vld [vmem:[%s2426_s4 + $0x10] sm:$0xff]  ;;  %v203_v20 = vld [vmem:[%s2426_s4 + $0x8] sm:$0xff] }
   0xf   :  { %v1936_v17 = vld [vmem:[%s2427_s5 + $0x10] sm:$0xff]  ;;  %v1955_v21 = vld [vmem:[%s2427_s5 + $0x8] sm:$0xff]  ;;  %v109_v22 = vld [vmem:[%s2424_s2] sm:$0xff]  ;;  %s1789_s2 = smov [#allocation6]  }
  0x10   :  { %100 = vmatpush.msra.mxu0 %v69_v8  ;;  %1453 = vmatpush.xpose.msk.msra.mxu1 %vm117_vm1, %v111_v14  ;;  %v159_v23 = vld [vmem:[%s2425_s3] sm:$0xff]  ;;  %v1996_v33 = vld [vmem:[%s2428_s6 + $0x18] sm:$0xff]  ;;  %v2010_v35 = vld [vmem:[%s2428_s6 + $0x10] sm:$0xff] }
  0x11   :  { %60 = vperm.xlu0 %1620, %v53_v7   ;;  %1459 = vmatpush.xpose.msk.msra.mxu2 %vm117_vm1, %v161_v15  ;;  %v202_v24 = vld [vmem:[%s2426_s4] sm:$0xff]  ;;  %v2021_v36 = vld [vmem:[%s2428_s6 + $0x8] sm:$0xff]  ;;  %v2026_v37 = vld [vmem:[%s2429_s7 + $0x18] sm:$0xff]  ;;  %s1426_s4 = sshll.u32 %s2438_s16, 4  ;;  %s1427_s4 = int_to_ptr.hbm [resolvable:$true] %s1426_s4 }
  0x12   :  { %101 = vmatpush.msra.mxu0 %v68_v9  ;;  %1465 = vmatpush.xpose.msk.msra.mxu3 %vm117_vm1, %v204_v16  ;;  %v1987_v32 = vld [vmem:[%s2427_s5] sm:$0xff]  ;;  %v2040_v39 = vld [vmem:[%s2429_s7 + $0x10] sm:$0xff]  ;;  %v2053_v40 = vld [vmem:[%s2429_s7 + $0x8] sm:$0xff]  ;;  %s1405_s5 = sshll.u32 %s2436_s14, 4  ;;  %s1406_s5 = int_to_ptr.hbm [resolvable:$true] %s1405_s5 }
  0x13   :  { %v2001_v34 = vld [vmem:[%s2434_s12] sm:$0x3] }
  0x14   :  { %1470 = vmatpush.xpose.msk.msrb.mxu0 %vm117_vm1, %v1919_v13  ;;  %1454 = vmatpush.xpose.msk.msra.mxu1 %vm117_vm1, %v110_v18  ;;  %v2035_v38 = vld [vmem:[%s2428_s6] sm:$0xff] }
  0x15   :  { %1460 = vmatpush.xpose.msk.msra.mxu2 %vm117_vm1, %v160_v19  ;;  %v2062_v41 = vld [vmem:[%s2429_s7] sm:$0xff]  ;;  %s1416_s7 = sshll.u32 %s2437_s15, 4  ;;  %s1792_s15 = smov [#allocation2]   ;;  %s1417_s7 = int_to_ptr.hbm [resolvable:$true] %s1416_s7 }
  0x16   :  { %1466 = vmatpush.xpose.msk.msra.mxu3 %vm117_vm1, %v203_v20  ;;  %v1621_v44 = vld [vmem:[%s2430_s8] ss:$0 sm:$0xff]  ;;  %s1424_s8 = sshll.u32 %s1789_s2, 4  ;;  %s1403_s16 = sshll.u32 %s1792_s15, 4  ;;  %s1425_s8 = int_to_ptr.vmem [resolvable:$true] %s1424_s8  ;;  %s1404_s16 = int_to_ptr.vmem [resolvable:$true] %s1403_s16 }
  0x17   :  { %v1622_v53 = vld [vmem:[%s2431_s9] ss:$0 sm:$0xff] }
  0x18   :  { %1471 = vmatpush.xpose.msk.msrb.mxu0 %vm117_vm1, %v1936_v17  ;;  %1455 = vmatpush.xpose.msk.msra.mxu1 %vm117_vm1, %v109_v22  ;;  %v2141_v1 = vld [vmem:[%s2433_s11] ss:$0 sm:$0xff] }
  0x19   :  { %1461 = vmatpush.xpose.msk.msra.mxu2 %vm117_vm1, %v159_v23  ;;  %v2147_v12 = vld [vmem:[%s2432_s10] ss:$0 sm:$0xff]  ;;  %s1790_s10 = smov 32  }
  0x1a   :  { %1467 = vmatpush.xpose.msk.msra.mxu3 %vm117_vm1, %v202_v24 }
  0x1c   :  { %1472 = vmatpush.xpose.msk.msrb.mxu0 %vm117_vm1, %v1955_v21  ;;  %1475 = vmatpush.xpose.msk.msrb.mxu1 %vm117_vm1, %v1996_v33 }
  0x1d   :  { %1480 = vmatpush.xpose.msk.msrb.mxu2 %vm117_vm1, %v2026_v37 }
  0x1e   :  { %1487 = vmatpush.xpose.msk.msrb.mxu3 %vm117_vm1, %v1919_v13 }
  0x20   :  { %1473 = vmatpush.xpose.msk.msrb.mxu0 %vm117_vm1, %v1987_v32  ;;  %1476 = vmatpush.xpose.msk.msrb.mxu1 %vm117_vm1, %v2010_v35 }
  0x21   :  { %1481 = vmatpush.xpose.msk.msrb.mxu2 %vm117_vm1, %v2040_v39 }
  0x22   :  { %1488 = vmatpush.xpose.msk.msrb.mxu3 %vm117_vm1, %v1936_v17 }
  0x24   :  { %1477 = vmatpush.xpose.msk.msrb.mxu1 %vm117_vm1, %v2021_v36 }
  0x25   :  { %1482 = vmatpush.xpose.msk.msrb.mxu2 %vm117_vm1, %v2053_v40 }
  0x26   :  { %1489 = vmatpush.xpose.msk.msrb.mxu3 %vm117_vm1, %v1955_v21 }
  0x28   :  { %1478 = vmatpush.xpose.msk.msrb.mxu1 %vm117_vm1, %v2035_v38 }
  0x29   :  { %1483 = vmatpush.xpose.msk.msrb.mxu2 %vm117_vm1, %v2062_v41 }
  0x2a   :  { %1490 = vmatpush.xpose.msk.msrb.mxu3 %vm117_vm1, %v1987_v32 }
  0x7b   :  { %v58_v27 = vpop.permute.xlu0 %57 }
  0x7c   :  { %vm62_vm3 = vcmp.eq.s32.totalorder %v58_v27, %v1976_v26 }
  0x7d   :  { %v1447_v29 = vsel %vm62_vm3, 1.0, %v1787_v28 }
  0x7e   :  { %1450 = vmatmul.msk.f32.vlgmr.msra.gmra.mxu0 %vm75_vm2, %v1447_v29 }
  0x7f   :  { %1492 = vmatpush.xpose.msk.msra.mxu0 %vm117_vm1, %v1996_v33 }
  0x83   :  { %v61_v30 = vpop.permute.xlu0 %60  ;;  %1493 = vmatpush.xpose.msk.msra.mxu0 %vm117_vm1, %v2010_v35 }
  0x84   :  { %vm63_vm4 = vcmp.eq.s32.totalorder %v61_v30, %v1976_v26 }
  0x85   :  { %v1448_v31 = vsel %vm63_vm4, 1.0, %v1787_v28 }
  0x86   :  { %1451 = vmatmul.msk.f32.gmra.mxu0 %vm75_vm2, %v1448_v31 }
  0x87   :  { %1494 = vmatpush.xpose.msk.msra.mxu0 %vm117_vm1, %v2021_v36 }
  0x8b   :  { %1495 = vmatpush.xpose.msk.msra.mxu0 %vm117_vm1, %v2035_v38 }
  0x8e   :  { %1474 = vmatmul.msk.f32.vlgmr.msrb.gmra.mxu0 %vm117_vm1, %v2001_v34 }
  0x8f   :  { %1515 = vmatpush.xpose.msk.msrb.mxu0 %vm117_vm1, %v2026_v37 }
  0x93   :  { %1516 = vmatpush.xpose.msk.msrb.mxu0 %vm117_vm1, %v2040_v39 }
  0x97   :  { %1517 = vmatpush.xpose.msk.msrb.mxu0 %vm117_vm1, %v2053_v40 }
  0x9b   :  { %1518 = vmatpush.xpose.msk.msrb.mxu0 %vm117_vm1, %v2062_v41 }
  0xfb   :  { %v103_v42 = vpop.f32.mrf.mxu0 }
  0xfc   :  { %1456 = vmatmul.msk.f32.vlgmr.msra.gmra.mxu1 %vm117_vm1, %v103_v42  ;;  %1462 = vmatmul.msk.f32.vlgmr.msra.gmra.mxu2 %vm117_vm1, %v103_v42 }
  0xfd   :  { %1468 = vmatmul.msk.f32.vlgmr.msra.gmra.mxu3 %vm117_vm1, %v103_v42  ;;  %1497 = vmatpush.xpose.msk.msra.mxu1 %vm117_vm1, %v2026_v37 }
  0xfe   :  { %1505 = vmatpush.xpose.msk.msra.mxu2 %vm117_vm1, %v1919_v13  ;;  %1510 = vmatpush.xpose.msk.msra.mxu3 %vm117_vm1, %v1996_v33 }
 0x101   :  { %1498 = vmatpush.xpose.msk.msra.mxu1 %vm117_vm1, %v2040_v39 }
 0x102   :  { %1506 = vmatpush.xpose.msk.msra.mxu2 %vm117_vm1, %v1936_v17  ;;  %1511 = vmatpush.xpose.msk.msra.mxu3 %vm117_vm1, %v2010_v35 }
 0x103   :  { %v106_v43 = vpop.f32.mrf.mxu0 }
 0x104   :  { %1457 = vmatmul.msk.f32.gmra.mxu1 %vm117_vm1, %v106_v43  ;;  %1463 = vmatmul.msk.f32.gmra.mxu2 %vm117_vm1, %v106_v43 }
 0x105   :  { %1469 = vmatmul.msk.f32.gmra.mxu3 %vm117_vm1, %v106_v43  ;;  %1499 = vmatpush.xpose.msk.msra.mxu1 %vm117_vm1, %v2053_v40 }
 0x106   :  { %1507 = vmatpush.xpose.msk.msra.mxu2 %vm117_vm1, %v1955_v21  ;;  %1512 = vmatpush.xpose.msk.msra.mxu3 %vm117_vm1, %v2021_v36 }
 0x109   :  { %1500 = vmatpush.xpose.msk.msra.mxu1 %vm117_vm1, %v2062_v41 }
 0x10a   :  { %1508 = vmatpush.xpose.msk.msra.mxu2 %vm117_vm1, %v1987_v32  ;;  %1513 = vmatpush.xpose.msk.msra.mxu3 %vm117_vm1, %v2035_v38 }
 0x10b   :  { %v291_v46 = vpop.f32.mrf.mxu0 }
 0x10c   :  { %1479 = vmatmul.msk.f32.vlgmr.msrb.gmra.mxu1 %vm117_vm1, %v2001_v34  ;;  %1484 = vmatmul.msk.f32.vlgmr.msrb.gmra.mxu2 %vm117_vm1, %v2001_v34 }
 0x10d   :  { %1523 = vmatpush.xpose.msk.msrb.mxu1 %vm117_vm1, %v1919_v13 }
 0x10e   :  { %1528 = vmatpush.xpose.msk.msrb.mxu2 %vm117_vm1, %v1996_v33 }
 0x111   :  { %1524 = vmatpush.xpose.msk.msrb.mxu1 %vm117_vm1, %v1936_v17 }
 0x112   :  { %1529 = vmatpush.xpose.msk.msrb.mxu2 %vm117_vm1, %v2010_v35 }
 0x115   :  { %1525 = vmatpush.xpose.msk.msrb.mxu1 %vm117_vm1, %v1955_v21 }
 0x116   :  { %1530 = vmatpush.xpose.msk.msrb.mxu2 %vm117_vm1, %v2021_v36 }
 0x119   :  { %1526 = vmatpush.xpose.msk.msrb.mxu1 %vm117_vm1, %v1987_v32 }
 0x11a   :  { %1531 = vmatpush.xpose.msk.msrb.mxu2 %vm117_vm1, %v2035_v38 }
 0x179   :  { %v153_v45 = vpop.f32.mrf.mxu1 }
 0x17a   :  { %v2125_v47 = vadd.f32 %v1621_v44, %v153_v45 }
 0x17c   :  { %v361_v48 = vadd.f32 %v291_v46, %v2125_v47  ;;  %v410_v46 = vld [vmem:[%s2435_s13] sm:$0x3] }
 0x17e   :  { %v1485_v49 = vmul.f32 -1.442695, %v361_v48 }
 0x17f   :  { %v196_v50 = vpop.f32.mrf.mxu2 }
 0x180   :  { %1625 = vpow2.f32 %v1485_v49  ;;  %v2133_v57 = vadd.f32 %v1622_v53, %v196_v50  ;;  %v239_v15 = vpop.f32.mrf.mxu3 }
 0x181   :  { %v156_v51 = vpop.f32.mrf.mxu1  ;;  %v2150_v19 = vadd.f32 %v2147_v12, %v239_v15 }
 0x182   :  { %v2128_v52 = vadd.f32 %v1621_v44, %v156_v51 }
 0x186   :  { %v1626_v54 = vpop.eup %1625 }
 0x187   :  { %v365_v55 = vadd.f32 1.0, %v1626_v54  ;;  %v199_v56 = vpop.f32.mrf.mxu2 }
 0x188   :  { %v2135_v58 = vadd.f32 %v1622_v53, %v199_v56  ;;  %v2193_v50 = vpop.f32.mrf.mxu3 }
 0x189   :  { %1627 = vrcp.f32 %v365_v55  ;;  %v323_v59 = vpop.f32.mrf.mxu1  ;;  %v377_v2 = vand.u32 2147483648, %v365_v55  ;;  %v375_v6 = vand.u32 2147483647, %v365_v55  ;;  %vm371_vm6 = vweird.f32 %v365_v55 }
 0x18a   :  { %v381_v60 = vadd.f32 %v323_v59, %v2133_v57 }
 0x18b   :  { %v378_v10 = vor.u32 1.1754944e-38, %v377_v2  ;;  %vm376_vm8 = vcmp.eq.f32.partialorder %v375_v6, 8.507059e+37 }
 0x18c   :  { %v1486_v61 = vmul.f32 -1.442695, %v381_v60 }
 0x18e   :  { %1629 = vpow2.f32 %v1486_v61 }
 0x18f   :  { %v1628_v62 = vpop.eup %1627  ;;  %v358_v4 = vpop.f32.mrf.mxu2 }
 0x190   :  { %v367_v63 = vmul.f32 %v1628_v62, %v365_v55  ;;  %vm372_vm5 = vweird.f32 %v1628_v62  ;;  %v359_v9 = vadd.f32 %v2141_v1, %v358_v4 }
 0x191   :  { %vm373_vm7 = vmor %vm371_vm6, %vm372_vm5 }
 0x192   :  { %v368_v0 = vsub.f32 1.0, %v367_v63 }
 0x194   :  { %v1630_v3 = vpop.eup %1629  ;;  %v369_v5 = vmul.f32 %v1628_v62, %v368_v0 }
 0x195   :  { %v385_v7 = vadd.f32 1.0, %v1630_v3 }
 0x196   :  { %v370_v8 = vadd.f32 %v1628_v62, %v369_v5 }
 0x197   :  { %1631 = vrcp.f32 %v385_v7  ;;  %v397_v24 = vand.u32 2147483648, %v385_v7  ;;  %v395_v27 = vand.u32 2147483647, %v385_v7  ;;  %vm391_vm10 = vweird.f32 %v385_v7 }
 0x198   :  { %v374_v11 = vsel %vm373_vm7, %v1628_v62, %v370_v8  ;;  %vm539_vm7 = vcmask 257026  }
 0x199   :  { %v379_v14 = vsel %vm376_vm8, %v378_v10, %v374_v11  ;;  %v398_v29 = vor.u32 1.1754944e-38, %v397_v24  ;;  %vm396_vm12 = vcmp.eq.f32.partialorder %v395_v27, 8.507059e+37 }
 0x19a   :  { %v401_v16 = vmul.f32 %v379_v14, %v359_v9 }
 0x19c   :  { %v402_v22 = vadd.f32 %v401_v16, %v2150_v19 }
 0x19d   :  { %v1632_v18 = vpop.eup %1631 }
 0x19e   :  { %v387_v20 = vmul.f32 %v1632_v18, %v385_v7  ;;  %vm392_vm9 = vweird.f32 %v1632_v18  ;;  %1633 = vtanh.f32 %v402_v22 }
 0x19f   :  { %vm393_vm11 = vmor %vm391_vm10, %vm392_vm9 }
 0x1a0   :  { %v388_v23 = vsub.f32 1.0, %v387_v20 }
 0x1a2   :  { %v389_v25 = vmul.f32 %v1632_v18, %v388_v23 }
 0x1a4   :  { %v390_v28 = vadd.f32 %v1632_v18, %v389_v25  ;;  %v1634_v43 = vpop.eup %1633 }
 0x1a6   :  { %v394_v30 = vsel %vm393_vm11, %v1632_v18, %v390_v28 }
 0x1a7   :  { %v399_v31 = vsel %vm396_vm12, %v398_v29, %v394_v30 }
 0x1a8   :  { %v404_v42 = vsub.f32 1.0, %v399_v31  ;;  %v406_v45 = vmul.f32 %v399_v31, %v2001_v34 }
 0x1aa   :  { %v405_v44 = vmul.f32 %v1634_v43, %v404_v42 }
 0x1ac   :  { %v2157_v48 = vadd.f32 %v406_v45, %v405_v44  ;;  %v1504_v44 = vld [vmem:[%s2435_s13 + $0x2] sm:$0x3] }
 0x1ae   :  { %1491 = vmatmul.msk.f32.vlgmr.msrb.gmra.mxu3 %vm117_vm1, %v2157_v48  ;;  %1496 = vmatmul.msk.f32.vlgmr.msra.gmra.mxu0 %vm117_vm1, %v2157_v48  ;;  %v411_v49 = vmul.f32 %v410_v46, %v2157_v48  ;;  %409 = vst.msk [vmem:[#allocation6] sm:$0x3] %vm408_vm13, %v2157_v48  ;;  %v534_v46 = vrot.slane %v2157_v48, 6 }
 0x1af   :  { %1501 = vmatmul.msk.f32.vlgmr.msra.gmra.mxu1 %vm117_vm1, %v2157_v48  ;;  %1533 = vmatpush.xpose.msk.msrb.mxu3 %vm117_vm1, %v2026_v37 }
 0x1b0   :  { %v412_v34 = vsel %vm408_vm13, %v411_v49, 0.0  ;;  %1541 = vmatpush.xpose.msk.msra.mxu0 %vm117_vm1, %v1919_v13  ;;  %1546 = vmatpush.xpose.msk.msra.mxu1 %vm117_vm1, %v1996_v33 }
 0x1b1   :  { %413 = vadd.xlane.f32.xlu1 %v412_v34 }
 0x1b3   :  { %1534 = vmatpush.xpose.msk.msrb.mxu3 %vm117_vm1, %v2040_v39 }
 0x1b4   :  { %1542 = vmatpush.xpose.msk.msra.mxu0 %vm117_vm1, %v1936_v17  ;;  %1547 = vmatpush.xpose.msk.msra.mxu1 %vm117_vm1, %v2010_v35 }
 0x1b7   :  { %1535 = vmatpush.xpose.msk.msrb.mxu3 %vm117_vm1, %v2053_v40 }
 0x1b8   :  { %1543 = vmatpush.xpose.msk.msra.mxu0 %vm117_vm1, %v1955_v21  ;;  %1548 = vmatpush.xpose.msk.msra.mxu1 %vm117_vm1, %v2021_v36 }
 0x1bb   :  { %1536 = vmatpush.xpose.msk.msrb.mxu3 %vm117_vm1, %v2062_v41 }
 0x1bc   :  { %1544 = vmatpush.xpose.msk.msra.mxu0 %vm117_vm1, %v1987_v32  ;;  %1549 = vmatpush.xpose.msk.msra.mxu1 %vm117_vm1, %v2035_v38 }
 0x22b   :  { %v457_v51 = vpop.f32.mrf.mxu0 }
 0x22c   :  { %v504_v53 = vrot.slane %v457_v51, 6  ;;  %v477_v8 = vpop.f32.mrf.mxu1 }
 0x22d   :  { %v478_v11 = vadd.f32 %v2141_v1, %v477_v8 }
 0x22e   :  { %v506_v54 = vadd.f32 %v504_v53, %v2133_v57  ;;  %v544_v53 = vrot.slane %v1504_v44, 6 }
 0x22f   :  { %v527_v22 = vrot.slane %v478_v11, 6 }
 0x230   :  { %v1503_v55 = vmul.f32 -1.442695, %v506_v54 }
 0x231   :  { %v437_v56 = vpop.f32.mrf.mxu3 }
 0x232   :  { %1635 = vpow2.f32 %v1503_v55  ;;  %v481_v59 = vrot.slane %v437_v56, 6 }
 0x234   :  { %v483_v60 = vadd.f32 %v481_v59, %v2125_v47 }
 0x236   :  { %v1502_v61 = vmul.f32 -1.442695, %v483_v60 }
 0x238   :  { %v1636_v62 = vpop.eup %1635  ;;  %1637 = vpow2.f32 %v1502_v61 }
 0x239   :  { %v510_v63 = vadd.f32 1.0, %v1636_v62 }
 0x23b   :  { %1639 = vrcp.f32 %v510_v63  ;;  %v522_v27 = vand.u32 2147483648, %v510_v63  ;;  %vm516_vm4 = vweird.f32 %v510_v63  ;;  %v520_v29 = vand.u32 2147483647, %v510_v63 }
 0x23d   :  { %v523_v42 = vor.u32 1.1754944e-38, %v522_v27  ;;  %vm521_vm6 = vcmp.eq.f32.partialorder %v520_v29, 8.507059e+37 }
 0x23e   :  { %v1638_v0 = vpop.eup %1637 }
 0x23f   :  { %v487_v2 = vadd.f32 1.0, %v1638_v0 }
 0x241   :  { %1641 = vrcp.f32 %v487_v2  ;;  %v1640_v3 = vpop.eup %1639  ;;  %v499_v10 = vand.u32 2147483648, %v487_v2  ;;  %v497_v15 = vand.u32 2147483647, %v487_v2  ;;  %vm493_vm15 = vweird.f32 %v487_v2 }
 0x242   :  { %v512_v4 = vmul.f32 %v1640_v3, %v510_v63  ;;  %vm517_vm3 = vweird.f32 %v1640_v3 }
 0x243   :  { %v500_v20 = vor.u32 1.1754944e-38, %v499_v10  ;;  %vm498_vm2 = vcmp.eq.f32.partialorder %v497_v15, 8.507059e+37  ;;  %vm518_vm5 = vmor %vm516_vm4, %vm517_vm3 }
 0x244   :  { %v513_v7 = vsub.f32 1.0, %v512_v4 }
 0x246   :  { %v514_v16 = vmul.f32 %v1640_v3, %v513_v7 }
 0x247   :  { %v1642_v5 = vpop.eup %1641 }
 0x248   :  { %v489_v6 = vmul.f32 %v1642_v5, %v487_v2  ;;  %vm494_vm14 = vweird.f32 %v1642_v5  ;;  %v515_v24 = vadd.f32 %v1640_v3, %v514_v16 }
 0x249   :  { %vm495_vm0 = vmor %vm493_vm15, %vm494_vm14 }
 0x24a   :  { %v490_v9 = vsub.f32 1.0, %v489_v6  ;;  %v519_v31 = vsel %vm518_vm5, %v1640_v3, %v515_v24 }
 0x24b   :  { %v524_v43 = vsel %vm521_vm6, %v523_v42, %v519_v31 }
 0x24c   :  { %v491_v14 = vmul.f32 %v1642_v5, %v490_v9  ;;  %v532_v45 = vsub.f32 1.0, %v524_v43  ;;  %v536_v34 = vmul.f32 %v534_v46, %v524_v43 }
 0x24e   :  { %v492_v18 = vadd.f32 %v1642_v5, %v491_v14 }
 0x250   :  { %v496_v23 = vsel %vm495_vm0, %v1642_v5, %v492_v18 }
 0x251   :  { %v501_v25 = vsel %vm498_vm2, %v500_v20, %v496_v23  ;;  %vm678_vm2 = vcmask 259076  }
 0x252   :  { %v529_v28 = vmul.f32 %v527_v22, %v501_v25 }
 0x254   :  { %v530_v30 = vadd.f32 %v529_v28, %v2150_v19 }
 0x256   :  { %1643 = vtanh.f32 %v530_v30 }
 0x25c   :  { %v1644_v49 = vpop.eup %1643 }
 0x25d   :  { %v533_v51 = vmul.f32 %v1644_v49, %v532_v45 }
 0x25f   :  { %v2203_v54 = vadd.f32 %v536_v34, %v533_v51  ;;  %v1522_v51 = vld [vmem:[%s2435_s13 + $0x4] sm:$0x3] }
 0x261   :  { %v556_v55 = vrot.slane %v2203_v54, 2  ;;  %540 = vst.msk [vmem:[#allocation6] sm:$0xc] %vm539_vm7, %v2203_v54  ;;  %v546_v56 = vmul.f32 %v544_v53, %v2203_v54 }
 0x263   :  { %1509 = vmatmul.msk.f32.vlgmr.msra.gmra.mxu2 %vm117_vm1, %v556_v55  ;;  %1514 = vmatmul.msk.f32.vlgmr.msra.gmra.mxu3 %vm117_vm1, %v556_v55  ;;  %v547_v48 = vsel %vm539_vm7, %v546_v56, 0.0 }
 0x264   :  { %1519 = vmatmul.msk.f32.vlgmr.msrb.gmra.mxu0 %vm117_vm1, %v556_v55  ;;  %548 = vadd.xlane.f32.xlu1 %v547_v48  ;;  %v673_v55 = vrot.slane %v2203_v54, 6 }
 0x265   :  { %1551 = vmatpush.xpose.msk.msra.mxu2 %vm117_vm1, %v2026_v37  ;;  %1559 = vmatpush.xpose.msk.msra.mxu3 %vm117_vm1, %v1919_v13 }
 0x266   :  { %1564 = vmatpush.xpose.msk.msrb.mxu0 %vm117_vm1, %v1996_v33 }
 0x269   :  { %1552 = vmatpush.xpose.msk.msra.mxu2 %vm117_vm1, %v2040_v39  ;;  %1560 = vmatpush.xpose.msk.msra.mxu3 %vm117_vm1, %v1936_v17 }
 0x26a   :  { %1565 = vmatpush.xpose.msk.msrb.mxu0 %vm117_vm1, %v2010_v35 }
 0x26d   :  { %1553 = vmatpush.xpose.msk.msra.mxu2 %vm117_vm1, %v2053_v40  ;;  %1561 = vmatpush.xpose.msk.msra.mxu3 %vm117_vm1, %v1955_v21 }
 0x26e   :  { %1566 = vmatpush.xpose.msk.msrb.mxu0 %vm117_vm1, %v2021_v36 }
 0x271   :  { %1554 = vmatpush.xpose.msk.msra.mxu2 %vm117_vm1, %v2062_v41  ;;  %1562 = vmatpush.xpose.msk.msra.mxu3 %vm117_vm1, %v1987_v32 }
 0x272   :  { %1567 = vmatpush.xpose.msk.msrb.mxu0 %vm117_vm1, %v2035_v38 }
 0x2e1   :  { %v616_v11 = vpop.f32.mrf.mxu0 }
 0x2e2   :  { %v617_v20 = vadd.f32 %v2141_v1, %v616_v11 }
 0x2e4   :  { %v666_v28 = vrot.slane %v617_v20, 4 }
 0x2e6   :  { %v576_v59 = vpop.f32.mrf.mxu2  ;;  %v596_v60 = vpop.f32.mrf.mxu3 }
 0x2e7   :  { %v620_v61 = vrot.slane %v576_v59, 4  ;;  %v643_v62 = vrot.slane %v596_v60, 4  ;;  %v683_v60 = vrot.slane %v1522_v51, 4 }
 0x2e9   :  { %v622_v63 = vadd.f32 %v620_v61, %v2125_v47  ;;  %v645_v0 = vadd.f32 %v643_v62, %v2133_v57 }
 0x2eb   :  { %v1520_v2 = vmul.f32 -1.442695, %v622_v63  ;;  %v1521_v3 = vmul.f32 -1.442695, %v645_v0 }
 0x2ed   :  { %1645 = vpow2.f32 %v1520_v2 }
 0x2ee   :  { %1647 = vpow2.f32 %v1521_v3 }
 0x2f3   :  { %v1646_v4 = vpop.eup %1645 }
 0x2f4   :  { %v1648_v5 = vpop.eup %1647  ;;  %v626_v6 = vadd.f32 1.0, %v1646_v4 }
 0x2f5   :  { %v649_v7 = vadd.f32 1.0, %v1648_v5 }
 0x2f6   :  { %1649 = vrcp.f32 %v626_v6  ;;  %v638_v16 = vand.u32 2147483648, %v626_v6  ;;  %v636_v23 = vand.u32 2147483647, %v626_v6  ;;  %vm632_vm9 = vweird.f32 %v626_v6 }
 0x2f7   :  { %1651 = vrcp.f32 %v649_v7  ;;  %v661_v43 = vand.u32 2147483648, %v649_v7  ;;  %vm655_vm14 = vweird.f32 %v649_v7  ;;  %v659_v44 = vand.u32 2147483647, %v649_v7 }
 0x2f8   :  { %v639_v27 = vor.u32 1.1754944e-38, %v638_v16  ;;  %vm637_vm11 = vcmp.eq.f32.partialorder %v636_v23, 8.507059e+37 }
 0x2f9   :  { %v662_v49 = vor.u32 1.1754944e-38, %v661_v43  ;;  %vm660_vm0 = vcmp.eq.f32.partialorder %v659_v44, 8.507059e+37 }
 0x2fc   :  { %v1650_v8 = vpop.eup %1649 }
 0x2fd   :  { %v1652_v9 = vpop.eup %1651  ;;  %v628_v10 = vmul.f32 %v1650_v8, %v626_v6  ;;  %vm633_vm8 = vweird.f32 %v1650_v8 }
 0x2fe   :  { %v651_v14 = vmul.f32 %v1652_v9, %v649_v7  ;;  %vm634_vm10 = vmor %vm632_vm9, %vm633_vm8  ;;  %vm656_vm12 = vweird.f32 %v1652_v9 }
 0x2ff   :  { %v629_v15 = vsub.f32 1.0, %v628_v10  ;;  %vm657_vm15 = vmor %vm655_vm14, %vm656_vm12  ;;  %vm817_vm12 = vcmask 261126  }
 0x300   :  { %v652_v18 = vsub.f32 1.0, %v651_v14 }
 0x301   :  { %v630_v22 = vmul.f32 %v1650_v8, %v629_v15 }
 0x302   :  { %v653_v24 = vmul.f32 %v1652_v9, %v652_v18 }
 0x303   :  { %v631_v25 = vadd.f32 %v1650_v8, %v630_v22 }
 0x304   :  { %v654_v31 = vadd.f32 %v1652_v9, %v653_v24 }
 0x305   :  { %v635_v29 = vsel %vm634_vm10, %v1650_v8, %v631_v25 }
 0x306   :  { %v640_v30 = vsel %vm637_vm11, %v639_v27, %v635_v29  ;;  %v658_v46 = vsel %vm657_vm15, %v1652_v9, %v654_v31 }
 0x307   :  { %v668_v42 = vmul.f32 %v666_v28, %v640_v30  ;;  %v663_v34 = vsel %vm660_vm0, %v662_v49, %v658_v46 }
 0x308   :  { %v671_v53 = vsub.f32 1.0, %v663_v34  ;;  %v675_v48 = vmul.f32 %v673_v55, %v663_v34 }
 0x309   :  { %v669_v45 = vadd.f32 %v668_v42, %v2150_v19 }
 0x30b   :  { %1653 = vtanh.f32 %v669_v45 }
 0x311   :  { %v1654_v56 = vpop.eup %1653 }
 0x312   :  { %v672_v59 = vmul.f32 %v1654_v56, %v671_v53  ;;  %v1540_v56 = vld [vmem:[%s2435_s13 + $0x6] sm:$0x3] }
 0x314   :  { %v2245_v61 = vadd.f32 %v675_v48, %v672_v59 }
 0x316   :  { %v695_v62 = vrot.slane %v2245_v61, 4  ;;  %v685_v63 = vmul.f32 %v683_v60, %v2245_v61  ;;  %679 = vst.msk [vmem:[#allocation6] sm:$0x30] %vm678_vm2, %v2245_v61  ;;  %v812_v59 = vrot.slane %v2245_v61, 6 }
 0x318   :  { %1527 = vmatmul.msk.f32.vlgmr.msrb.gmra.mxu1 %vm117_vm1, %v695_v62  ;;  %1532 = vmatmul.msk.f32.vlgmr.msrb.gmra.mxu2 %vm117_vm1, %v695_v62  ;;  %v686_v54 = vsel %vm678_vm2, %v685_v63, 0.0 }
 0x319   :  { %1537 = vmatmul.msk.f32.vlgmr.msrb.gmra.mxu3 %vm117_vm1, %v695_v62  ;;  %687 = vadd.xlane.f32.xlu2 %v686_v54  ;;  %v822_v54 = vrot.slane %v1540_v56, 2 }
 0x31a   :  { %1569 = vmatpush.xpose.msk.msrb.mxu1 %vm117_vm1, %v2026_v37  ;;  %1577 = vmatpush.xpose.msk.msrb.mxu2 %vm117_vm1, %v1919_v13 }
 0x31b   :  { %1582 = vmatpush.xpose.msk.msrb.mxu3 %vm117_vm1, %v1996_v33 }
 0x31e   :  { %1570 = vmatpush.xpose.msk.msrb.mxu1 %vm117_vm1, %v2040_v39  ;;  %1578 = vmatpush.xpose.msk.msrb.mxu2 %vm117_vm1, %v1936_v17 }
 0x31f   :  { %1583 = vmatpush.xpose.msk.msrb.mxu3 %vm117_vm1, %v2010_v35 }
 0x322   :  { %1571 = vmatpush.xpose.msk.msrb.mxu1 %vm117_vm1, %v2053_v40  ;;  %1579 = vmatpush.xpose.msk.msrb.mxu2 %vm117_vm1, %v1955_v21 }
 0x323   :  { %1584 = vmatpush.xpose.msk.msrb.mxu3 %vm117_vm1, %v2021_v36 }
 0x326   :  { %1572 = vmatpush.xpose.msk.msrb.mxu1 %vm117_vm1, %v2062_v41  ;;  %1580 = vmatpush.xpose.msk.msrb.mxu2 %vm117_vm1, %v1987_v32 }
 0x327   :  { %1585 = vmatpush.xpose.msk.msrb.mxu3 %vm117_vm1, %v2035_v38 }
 0x395   :  { %v715_v0 = vpop.f32.mrf.mxu1 }
 0x396   :  { %v759_v2 = vrot.slane %v715_v0, 2 }
 0x398   :  { %v761_v3 = vadd.f32 %v759_v2, %v2125_v47 }
 0x39a   :  { %v1538_v4 = vmul.f32 -1.442695, %v761_v3 }
 0x39b   :  { %v735_v5 = vpop.f32.mrf.mxu2 }
 0x39c   :  { %1655 = vpow2.f32 %v1538_v4  ;;  %v782_v6 = vrot.slane %v735_v5, 2  ;;  %v755_v18 = vpop.f32.mrf.mxu3 }
 0x39d   :  { %v756_v47 = vadd.f32 %v2141_v1, %v755_v18 }
 0x39e   :  { %v784_v7 = vadd.f32 %v782_v6, %v2133_v57 }
 0x39f   :  { %v805_v31 = vrot.slane %v756_v47, 2 }
 0x3a0   :  { %v1539_v8 = vmul.f32 -1.442695, %v784_v7 }
 0x3a2   :  { %v1656_v9 = vpop.eup %1655  ;;  %1657 = vpow2.f32 %v1539_v8 }
 0x3a3   :  { %v765_v10 = vadd.f32 1.0, %v1656_v9 }
 0x3a5   :  { %1659 = vrcp.f32 %v765_v10  ;;  %v777_v22 = vand.u32 2147483648, %v765_v10  ;;  %v775_v24 = vand.u32 2147483647, %v765_v10  ;;  %vm771_vm4 = vweird.f32 %v765_v10 }
 0x3a7   :  { %v778_v28 = vor.u32 1.1754944e-38, %v777_v22  ;;  %vm776_vm6 = vcmp.eq.f32.partialorder %v775_v24, 8.507059e+37 }
 0x3a8   :  { %v1658_v11 = vpop.eup %1657 }
 0x3a9   :  { %v788_v14 = vadd.f32 1.0, %v1658_v11 }
 0x3ab   :  { %v1660_v15 = vpop.eup %1659  ;;  %1661 = vrcp.f32 %v788_v14  ;;  %v800_v44 = vand.u32 2147483648, %v788_v14  ;;  %v798_v46 = vand.u32 2147483647, %v788_v14  ;;  %vm794_vm9 = vweird.f32 %v788_v14 }
 0x3ac   :  { %v767_v16 = vmul.f32 %v1660_v15, %v765_v10  ;;  %vm772_vm3 = vweird.f32 %v1660_v15 }
 0x3ad   :  { %vm773_vm5 = vmor %vm771_vm4, %vm772_vm3  ;;  %v801_v51 = vor.u32 1.1754944e-38, %v800_v44  ;;  %vm799_vm11 = vcmp.eq.f32.partialorder %v798_v46, 8.507059e+37 }
 0x3ae   :  { %v768_v20 = vsub.f32 1.0, %v767_v16 }
 0x3b0   :  { %v769_v23 = vmul.f32 %v1660_v15, %v768_v20 }
 0x3b1   :  { %v1662_v25 = vpop.eup %1661 }
 0x3b2   :  { %v790_v57 = vmul.f32 %v1662_v25, %v788_v14  ;;  %v770_v27 = vadd.f32 %v1660_v15, %v769_v23  ;;  %vm795_vm8 = vweird.f32 %v1662_v25 }
 0x3b3   :  { %vm796_vm10 = vmor %vm794_vm9, %vm795_vm8 }
 0x3b4   :  { %v791_v29 = vsub.f32 1.0, %v790_v57  ;;  %v774_v30 = vsel %vm773_vm5, %v1660_v15, %v770_v27  ;;  %v2326_v57 = vadd.f32 %v2147_v12, %v2193_v50  ;;  %v1558_v12 = vld [vmem:[%s2435_s13 + $0x8] sm:$0x3] }
 0x3b5   :  { %v779_v42 = vsel %vm776_vm6, %v778_v28, %v774_v30 }
 0x3b6   :  { %v792_v43 = vmul.f32 %v1662_v25, %v791_v29  ;;  %v807_v45 = vmul.f32 %v805_v31, %v779_v42 }
 0x3b8   :  { %v793_v49 = vadd.f32 %v1662_v25, %v792_v43  ;;  %v808_v34 = vadd.f32 %v807_v45, %v2150_v19 }
 0x3ba   :  { %v797_v53 = vsel %vm796_vm10, %v1662_v25, %v793_v49  ;;  %1663 = vtanh.f32 %v808_v34 }
 0x3bb   :  { %v802_v55 = vsel %vm799_vm11, %v801_v51, %v797_v53 }
 0x3bc   :  { %v810_v48 = vsub.f32 1.0, %v802_v55  ;;  %v814_v63 = vmul.f32 %v812_v59, %v802_v55 }
 0x3c0   :  { %v1664_v60 = vpop.eup %1663 }
 0x3c1   :  { %v811_v62 = vmul.f32 %v1664_v60, %v810_v48 }
 0x3c3   :  { %v815_v0 = vadd.f32 %v814_v63, %v811_v62 }
 0x3c5   :  { %v2287_v19 = vrot.slane %v815_v0, 6  ;;  %818 = vst.msk [vmem:[#allocation6] sm:$0xc0] %vm817_vm12, %v815_v0  ;;  %v824_v2 = vmul.f32 %v822_v54, %v815_v0 }
 0x3c7   :  { %1545 = vmatmul.msk.f32.vlgmr.msra.gmra.mxu0 %vm117_vm1, %v2287_v19  ;;  %1550 = vmatmul.msk.f32.vlgmr.msra.gmra.mxu1 %vm117_vm1, %v2287_v19  ;;  %v825_v3 = vsel %vm817_vm12, %v824_v2, 0.0 }
 0x3c8   :  { %1555 = vmatmul.msk.f32.vlgmr.msra.gmra.mxu2 %vm117_vm1, %v2287_v19  ;;  %826 = vadd.xlane.f32.xlu2 %v825_v3 }
 0x3c9   :  { %1587 = vmatpush.xpose.msk.msra.mxu0 %vm117_vm1, %v2026_v37  ;;  %1595 = vmatpush.xpose.msk.msra.mxu1 %vm117_vm1, %v1919_v13 }
 0x3ca   :  { %1600 = vmatpush.xpose.msk.msra.mxu2 %vm117_vm1, %v1996_v33 }
 0x3cd   :  { %1588 = vmatpush.xpose.msk.msra.mxu0 %vm117_vm1, %v2040_v39  ;;  %1596 = vmatpush.xpose.msk.msra.mxu1 %vm117_vm1, %v1936_v17 }
 0x3ce   :  { %1601 = vmatpush.xpose.msk.msra.mxu2 %vm117_vm1, %v2010_v35 }
 0x3d1   :  { %1589 = vmatpush.xpose.msk.msra.mxu0 %vm117_vm1, %v2053_v40  ;;  %1597 = vmatpush.xpose.msk.msra.mxu1 %vm117_vm1, %v1955_v21 }
 0x3d2   :  { %1602 = vmatpush.xpose.msk.msra.mxu2 %vm117_vm1, %v2021_v36 }
 0x3d5   :  { %1590 = vmatpush.xpose.msk.msra.mxu0 %vm117_vm1, %v2062_v41  ;;  %1598 = vmatpush.xpose.msk.msra.mxu1 %vm117_vm1, %v1987_v32 }
 0x3d6   :  { %1603 = vmatpush.xpose.msk.msra.mxu2 %vm117_vm1, %v2035_v38 }
 0x444   :  { %v854_v13 = vpop.f32.mrf.mxu0  ;;  %v874_v17 = vpop.f32.mrf.mxu1 }
 0x445   :  { %v897_v33 = vadd.f32 %v854_v13, %v2128_v52  ;;  %v917_v35 = vadd.f32 %v874_v17, %v2135_v58 }
 0x447   :  { %v1556_v61 = vmul.f32 -1.442695, %v897_v33  ;;  %v1557_v21 = vmul.f32 -1.442695, %v917_v35 }
 0x449   :  { %1665 = vpow2.f32 %v1556_v61 }
 0x44a   :  { %1667 = vpow2.f32 %v1557_v21 }
 0x44b   :  { %v894_v18 = vpop.f32.mrf.mxu2 }
 0x44c   :  { %v895_v47 = vadd.f32 %v2141_v1, %v894_v18  ;;  %v1576_v18 = vld [vmem:[%s2435_s13 + $0xa] sm:$0x3] }
 0x44f   :  { %v1666_v36 = vpop.eup %1665 }
 0x450   :  { %v1668_v4 = vpop.eup %1667  ;;  %v901_v5 = vadd.f32 1.0, %v1666_v36 }
 0x451   :  { %v921_v6 = vadd.f32 1.0, %v1668_v4 }
 0x452   :  { %1669 = vrcp.f32 %v901_v5  ;;  %v913_v11 = vand.u32 2147483648, %v901_v5  ;;  %v911_v15 = vand.u32 2147483647, %v901_v5  ;;  %vm907_vm15 = vweird.f32 %v901_v5 }
 0x453   :  { %1671 = vrcp.f32 %v921_v6  ;;  %v933_v27 = vand.u32 2147483648, %v921_v6  ;;  %vm927_vm5 = vweird.f32 %v921_v6  ;;  %v931_v29 = vand.u32 2147483647, %v921_v6 }
 0x454   :  { %v914_v22 = vor.u32 1.1754944e-38, %v913_v11  ;;  %vm912_vm3 = vcmp.eq.f32.partialorder %v911_v15, 8.507059e+37 }
 0x455   :  { %v934_v42 = vor.u32 1.1754944e-38, %v933_v27  ;;  %vm932_vm8 = vcmp.eq.f32.partialorder %v931_v29, 8.507059e+37 }
 0x458   :  { %v1670_v32 = vpop.eup %1669 }
 0x459   :  { %v1672_v7 = vpop.eup %1671  ;;  %v903_v8 = vmul.f32 %v1670_v32, %v901_v5  ;;  %vm908_vm14 = vweird.f32 %v1670_v32 }
 0x45a   :  { %v923_v38 = vmul.f32 %v1672_v7, %v921_v6  ;;  %vm909_vm0 = vmor %vm907_vm15, %vm908_vm14  ;;  %vm928_vm4 = vweird.f32 %v1672_v7 }
 0x45b   :  { %v904_v9 = vsub.f32 1.0, %v903_v8  ;;  %vm929_vm6 = vmor %vm927_vm5, %vm928_vm4 }
 0x45c   :  { %v924_v10 = vsub.f32 1.0, %v923_v38 }
 0x45d   :  { %v905_v14 = vmul.f32 %v1670_v32, %v904_v9 }
 0x45e   :  { %v925_v16 = vmul.f32 %v1672_v7, %v924_v10 }
 0x45f   :  { %v906_v20 = vadd.f32 %v1670_v32, %v905_v14 }
 0x460   :  { %v926_v24 = vadd.f32 %v1672_v7, %v925_v16 }
 0x461   :  { %v910_v23 = vsel %vm909_vm0, %v1670_v32, %v906_v20 }
 0x462   :  { %v915_v25 = vsel %vm912_vm3, %v914_v22, %v910_v23  ;;  %v930_v31 = vsel %vm929_vm6, %v1672_v7, %v926_v24 }
 0x463   :  { %v937_v28 = vmul.f32 %v915_v25, %v895_v47  ;;  %v935_v43 = vsel %vm932_vm8, %v934_v42, %v930_v31  ;;  %v1084_v25 = vrot.slane %v1576_v18, 6 }
 0x464   :  { %v940_v44 = vsub.f32 1.0, %v935_v43  ;;  %v943_v49 = vmul.f32 %v935_v43, %v2287_v19 }
 0x465   :  { %v938_v30 = vadd.f32 %v937_v28, %v2326_v57 }
 0x467   :  { %1673 = vtanh.f32 %v938_v30 }
 0x46d   :  { %v1674_v45 = vpop.eup %1673 }
 0x46e   :  { %v941_v46 = vmul.f32 %v1674_v45, %v940_v44 }
 0x470   :  { %v2333_v50 = vadd.f32 %v943_v49, %v941_v46 }
 0x472   :  { %946 = vst.msk [vmem:[#allocation6 + $0x8] sm:$0x3] %vm408_vm13, %v2333_v50  ;;  %1563 = vmatmul.msk.f32.vlgmr.msra.gmra.mxu3 %vm117_vm1, %v2333_v50  ;;  %1568 = vmatmul.msk.f32.vlgmr.msrb.gmra.mxu0 %vm117_vm1, %v2333_v50  ;;  %v949_v34 = vmul.f32 %v1558_v12, %v2333_v50  ;;  %v1075_v22 = vrot.slane %v2333_v50, 6 }
 0x473   :  { %1573 = vmatmul.msk.f32.vlgmr.msrb.gmra.mxu1 %vm117_vm1, %v2333_v50  ;;  %1605 = vmatpush.xpose.msk.msra.mxu3 %vm117_vm1, %v2026_v37 }
 0x474   :  { %v950_v51 = vsel %vm408_vm13, %v949_v34, 0.0 }
 0x475   :  { %951 = vadd.xlane.f32.xlu0 %v950_v51 }
 0x477   :  { %1606 = vmatpush.xpose.msk.msra.mxu3 %vm117_vm1, %v2040_v39 }
 0x47b   :  { %1607 = vmatpush.xpose.msk.msra.mxu3 %vm117_vm1, %v2053_v40 }
 0x47f   :  { %1608 = vmatpush.xpose.msk.msra.mxu3 %vm117_vm1, %v2062_v41 }
 0x4ef   :  { %v998_v53 = vpop.f32.mrf.mxu0 }
 0x4f0   :  { %v1045_v55 = vrot.slane %v998_v53, 6  ;;  %v1018_v13 = vpop.f32.mrf.mxu1 }
 0x4f1   :  { %v1019_v35 = vadd.f32 %v2141_v1, %v1018_v13 }
 0x4f2   :  { %v1047_v56 = vadd.f32 %v1045_v55, %v2135_v58 }
 0x4f3   :  { %v1068_v6 = vrot.slane %v1019_v35, 6 }
 0x4f4   :  { %v1575_v48 = vmul.f32 -1.442695, %v1047_v56 }
 0x4f5   :  { %v978_v59 = vpop.f32.mrf.mxu3 }
 0x4f6   :  { %1675 = vpow2.f32 %v1575_v48  ;;  %v1022_v37 = vrot.slane %v978_v59, 6 }
 0x4f8   :  { %v1024_v60 = vadd.f32 %v1022_v37, %v2128_v52 }
 0x4fa   :  { %v1574_v62 = vmul.f32 -1.442695, %v1024_v60 }
 0x4fc   :  { %v1676_v63 = vpop.eup %1675  ;;  %1677 = vpow2.f32 %v1574_v62 }
 0x4fd   :  { %v1051_v39 = vadd.f32 1.0, %v1676_v63 }
 0x4ff   :  { %1679 = vrcp.f32 %v1051_v39  ;;  %v1063_v38 = vand.u32 2147483648, %v1051_v39  ;;  %vm1057_vm15 = vweird.f32 %v1051_v39  ;;  %v1061_v10 = vand.u32 2147483647, %v1051_v39 }
 0x501   :  { %v1064_v15 = vor.u32 1.1754944e-38, %v1063_v38  ;;  %vm1062_vm3 = vcmp.eq.f32.partialorder %v1061_v10, 8.507059e+37 }
 0x502   :  { %v1678_v54 = vpop.eup %1677 }
 0x503   :  { %v1028_v40 = vadd.f32 1.0, %v1678_v54 }
 0x505   :  { %1681 = vrcp.f32 %v1028_v40  ;;  %v1680_v0 = vpop.eup %1679  ;;  %v1040_v33 = vand.u32 2147483648, %v1028_v40  ;;  %v1038_v21 = vand.u32 2147483647, %v1028_v40  ;;  %vm1034_vm9 = vweird.f32 %v1028_v40 }
 0x506   :  { %v1053_v41 = vmul.f32 %v1680_v0, %v1051_v39  ;;  %vm1058_vm14 = vweird.f32 %v1680_v0 }
 0x507   :  { %v1041_v5 = vor.u32 1.1754944e-38, %v1040_v33  ;;  %vm1039_vm11 = vcmp.eq.f32.partialorder %v1038_v21, 8.507059e+37  ;;  %vm1059_vm0 = vmor %vm1057_vm15, %vm1058_vm14 }
 0x508   :  { %v1054_v3 = vsub.f32 1.0, %v1053_v41 }
 0x50a   :  { %v1055_v36 = vmul.f32 %v1680_v0, %v1054_v3 }
 0x50b   :  { %v1682_v19 = vpop.eup %1681 }
 0x50c   :  { %v1030_v2 = vmul.f32 %v1682_v19, %v1028_v40  ;;  %vm1035_vm13 = vweird.f32 %v1682_v19  ;;  %v1056_v7 = vadd.f32 %v1680_v0, %v1055_v36 }
 0x50d   :  { %vm1036_vm10 = vmor %vm1034_vm9, %vm1035_vm13 }
 0x50e   :  { %v1031_v17 = vsub.f32 1.0, %v1030_v2  ;;  %v1060_v14 = vsel %vm1059_vm0, %v1680_v0, %v1056_v7 }
 0x50f   :  { %v1065_v16 = vsel %vm1062_vm3, %v1064_v15, %v1060_v14 }
 0x510   :  { %v1032_v61 = vmul.f32 %v1682_v19, %v1031_v17  ;;  %v1073_v20 = vsub.f32 1.0, %v1065_v16  ;;  %v1077_v23 = vmul.f32 %v1075_v22, %v1065_v16 }
 0x512   :  { %v1033_v4 = vadd.f32 %v1682_v19, %v1032_v61 }
 0x514   :  { %v1037_v32 = vsel %vm1036_vm10, %v1682_v19, %v1033_v4 }
 0x515   :  { %v1042_v8 = vsel %vm1039_vm11, %v1041_v5, %v1037_v32  ;;  %v1594_v5 = vld [vmem:[%s2435_s13 + $0xc] sm:$0x3] }
 0x516   :  { %v1070_v9 = vmul.f32 %v1068_v6, %v1042_v8 }
 0x518   :  { %v1071_v11 = vadd.f32 %v1070_v9, %v2326_v57  ;;  %v1222_v9 = vrot.slane %v1594_v5, 4  ;;  %v688_v5 = vpop.xlane.xlu2 %687 }
 0x51a   :  { %1683 = vtanh.f32 %v1071_v11 }
 0x520   :  { %v1684_v47 = vpop.eup %1683 }
 0x521   :  { %v1074_v24 = vmul.f32 %v1684_v47, %v1073_v20 }
 0x523   :  { %v2361_v27 = vadd.f32 %v1077_v23, %v1074_v24 }
 0x525   :  { %1080 = vst.msk [vmem:[#allocation6 + $0x8] sm:$0xc] %vm539_vm7, %v2361_v27  ;;  %v1096_v28 = vrot.slane %v2361_v27, 2  ;;  %v1086_v29 = vmul.f32 %v1084_v25, %v2361_v27  ;;  %v1213_v32 = vrot.slane %v2361_v27, 6 }
 0x527   :  { %1581 = vmatmul.msk.f32.vlgmr.msrb.gmra.mxu2 %vm117_vm1, %v1096_v28  ;;  %1586 = vmatmul.msk.f32.vlgmr.msrb.gmra.mxu3 %vm117_vm1, %v1096_v28  ;;  %v1087_v30 = vsel %vm539_vm7, %v1086_v29, 0.0 }
 0x528   :  { %1591 = vmatmul.msk.f32.vlgmr.msra.gmra.mxu0 %vm117_vm1, %v1096_v28  ;;  %1088 = vadd.xlane.f32.xlu1 %v1087_v30 }
 0x5a5   :  { %v1156_v59 = vpop.f32.mrf.mxu0 }
 0x5a6   :  { %v1157_v39 = vadd.f32 %v2141_v1, %v1156_v59 }
 0x5a8   :  { %v1206_v2 = vrot.slane %v1157_v39, 4 }
 0x5aa   :  { %v1116_v31 = vpop.f32.mrf.mxu2  ;;  %v1136_v42 = vpop.f32.mrf.mxu3 }
 0x5ab   :  { %v1160_v43 = vrot.slane %v1116_v31, 4  ;;  %v1183_v44 = vrot.slane %v1136_v42, 4 }
 0x5ad   :  { %v1162_v45 = vadd.f32 %v1160_v43, %v2128_v52  ;;  %v1185_v46 = vadd.f32 %v1183_v44, %v2135_v58 }
 0x5af   :  { %v1592_v49 = vmul.f32 -1.442695, %v1162_v45  ;;  %v1593_v12 = vmul.f32 -1.442695, %v1185_v46 }
 0x5b1   :  { %1685 = vpow2.f32 %v1592_v49 }
 0x5b2   :  { %1687 = vpow2.f32 %v1593_v12 }
 0x5b7   :  { %v1686_v50 = vpop.eup %1685 }
 0x5b8   :  { %v1688_v34 = vpop.eup %1687  ;;  %v1166_v51 = vadd.f32 1.0, %v1686_v50 }
 0x5b9   :  { %v1189_v53 = vadd.f32 1.0, %v1688_v34 }
 0x5ba   :  { %1689 = vrcp.f32 %v1166_v51  ;;  %v1178_v62 = vand.u32 2147483648, %v1166_v51  ;;  %v1176_v40 = vand.u32 2147483647, %v1166_v51  ;;  %vm1172_vm4 = vweird.f32 %v1166_v51 }
 0x5bb   :  { %1691 = vrcp.f32 %v1189_v53  ;;  %v1201_v35 = vand.u32 2147483648, %v1189_v53  ;;  %vm1195_vm13 = vweird.f32 %v1189_v53  ;;  %v1199_v61 = vand.u32 2147483647, %v1189_v53 }
 0x5bc   :  { %v1179_v19 = vor.u32 1.1754944e-38, %v1178_v62  ;;  %vm1177_vm6 = vcmp.eq.f32.partialorder %v1176_v40, 8.507059e+37 }
 0x5bd   :  { %v1202_v36 = vor.u32 1.1754944e-38, %v1201_v35  ;;  %vm1200_vm10 = vcmp.eq.f32.partialorder %v1199_v61, 8.507059e+37 }
 0x5c0   :  { %v1690_v55 = vpop.eup %1689 }
 0x5c1   :  { %v1692_v56 = vpop.eup %1691  ;;  %v1168_v48 = vmul.f32 %v1690_v55, %v1166_v51  ;;  %vm1173_vm7 = vweird.f32 %v1690_v55 }
 0x5c2   :  { %v1191_v37 = vmul.f32 %v1692_v56, %v1189_v53  ;;  %vm1174_vm5 = vmor %vm1172_vm4, %vm1173_vm7  ;;  %vm1196_vm8 = vweird.f32 %v1692_v56  ;;  %vm415_vm4 = vcmp.eq.s32.totalorder %v1976_v26, 0 }
 0x5c3   :  { %v1169_v60 = vsub.f32 1.0, %v1168_v48  ;;  %vm1197_vm9 = vmor %vm1195_vm13, %vm1196_vm8  ;;  %vm828_vm8 = vcmp.eq.s32.totalorder %v1976_v26, 3  ;;  %vm1090_vm13 = vcmp.eq.s32.totalorder %v1976_v26, 5 }
 0x5c4   :  { %v1192_v63 = vsub.f32 1.0, %v1191_v37 }
 0x5c5   :  { %v1170_v54 = vmul.f32 %v1690_v55, %v1169_v60 }
 0x5c6   :  { %v1193_v0 = vmul.f32 %v1692_v56, %v1192_v63 }
 0x5c7   :  { %v1171_v41 = vadd.f32 %v1690_v55, %v1170_v54 }
 0x5c8   :  { %v1194_v17 = vadd.f32 %v1692_v56, %v1193_v0 }
 0x5c9   :  { %v1175_v3 = vsel %vm1174_vm5, %v1690_v55, %v1171_v41  ;;  %v1612_v41 = vld [vmem:[%s2435_s13 + $0xe] sm:$0x3]  ;;  %vm550_vm5 = vcmp.eq.s32.totalorder %v1976_v26, 1 }
 0x5ca   :  { %v1180_v13 = vsel %vm1177_vm6, %v1179_v19, %v1175_v3  ;;  %v1198_v21 = vsel %vm1197_vm9, %v1692_v56, %v1194_v17  ;;  %vm689_vm6 = vcmp.eq.s32.totalorder %v1976_v26, 2  ;;  %vm1228_vm9 = vcmp.eq.s32.totalorder %v1976_v26, 6 }
 0x5cb   :  { %v1208_v33 = vmul.f32 %v1206_v2, %v1180_v13  ;;  %v1203_v4 = vsel %vm1200_vm10, %v1202_v36, %v1198_v21  ;;  %vm1366_vm10 = vcmp.eq.s32.totalorder %v1976_v26, 7 }
 0x5cc   :  { %v1211_v6 = vsub.f32 1.0, %v1203_v4  ;;  %v1215_v8 = vmul.f32 %v1213_v32, %v1203_v4 }
 0x5cd   :  { %v1209_v1 = vadd.f32 %v1208_v33, %v2326_v57  ;;  %v1360_v33 = vrot.slane %v1612_v41, 2 }
 0x5cf   :  { %1693 = vtanh.f32 %v1209_v1  ;;  %v414_v1 = vpop.xlane.xlu1 %413 }
 0x5d0   :  { %v416_v21 = vsel %vm415_vm4, %v414_v1, 0.0 }
 0x5d1   :  { %v552_v4 = vrot.slane %v416_v21, 6 }
 0x5d5   :  { %v1694_v7 = vpop.eup %1693 }
 0x5d6   :  { %v1212_v38 = vmul.f32 %v1694_v7, %v1211_v6 }
 0x5d7   :  { %v549_v36 = vpop.xlane.xlu1 %548 }
 0x5d8   :  { %v2379_v10 = vadd.f32 %v1215_v8, %v1212_v38  ;;  %v554_v6 = vsel %vm550_vm5, %v549_v36, %v552_v4  ;;  %v827_v8 = vpop.xlane.xlu2 %826 }
 0x5d9   :  { %v691_v32 = vrot.slane %v554_v6, 6 }
 0x5da   :  { %1218 = vst.msk [vmem:[#allocation6 + $0x8] sm:$0x30] %vm678_vm2, %v2379_v10  ;;  %v1234_v11 = vrot.slane %v2379_v10, 4  ;;  %v1224_v14 = vmul.f32 %v1222_v9, %v2379_v10  ;;  %v1351_v2 = vrot.slane %v2379_v10, 6  ;;  %v952_v10 = vpop.xlane.xlu0 %951 }
 0x5db   :  { %v693_v7 = vsel %vm689_vm6, %v688_v5, %v691_v32 }
 0x5dc   :  { %1599 = vmatmul.msk.f32.vlgmr.msra.gmra.mxu1 %vm117_vm1, %v1234_v11  ;;  %1604 = vmatmul.msk.f32.vlgmr.msra.gmra.mxu2 %vm117_vm1, %v1234_v11  ;;  %v1225_v15 = vsel %vm678_vm2, %v1224_v14, 0.0  ;;  %v830_v38 = vrot.slane %v693_v7, 6 }
 0x5dd   :  { %1609 = vmatmul.msk.f32.vlgmr.msra.gmra.mxu3 %vm117_vm1, %v1234_v11  ;;  %1226 = vadd.xlane.f32.xlu2 %v1225_v15 }
 0x5de   :  { %v832_v9 = vsel %vm828_vm8, %v827_v8, %v830_v38 }
 0x5df   :  { %v955_v11 = vrot.slane %v832_v9, 6  ;;  %v1089_v15 = vpop.xlane.xlu1 %1088 }
 0x659   :  { %v1254_v16 = vpop.f32.mrf.mxu1 }
 0x65a   :  { %v1298_v18 = vrot.slane %v1254_v16, 2 }
 0x65c   :  { %v1300_v20 = vadd.f32 %v1298_v18, %v2128_v52  ;;  %v1709_v52 = vld [vmem:[%s2433_s11] ss:$0 sm:$0xff] }
 0x65e   :  { %v1610_v22 = vmul.f32 -1.442695, %v1300_v20  ;;  %v1227_v20 = vpop.xlane.xlu2 %1226 }
 0x65f   :  { %v1274_v47 = vpop.f32.mrf.mxu2 }
 0x660   :  { %1695 = vpow2.f32 %v1610_v22  ;;  %v1321_v23 = vrot.slane %v1274_v47, 2  ;;  %v1294_v43 = vpop.f32.mrf.mxu3 }
 0x661   :  { %v1295_v46 = vadd.f32 %v1709_v52, %v1294_v43 }
 0x662   :  { %v1323_v24 = vadd.f32 %v1321_v23, %v2135_v58 }
 0x663   :  { %v1344_v56 = vrot.slane %v1295_v46, 2 }
 0x664   :  { %v1611_v25 = vmul.f32 -1.442695, %v1323_v24 }
 0x666   :  { %v1696_v27 = vpop.eup %1695  ;;  %1697 = vpow2.f32 %v1611_v25 }
 0x667   :  { %v1304_v28 = vadd.f32 1.0, %v1696_v27 }
 0x669   :  { %1699 = vrcp.f32 %v1304_v28  ;;  %v1316_v45 = vand.u32 2147483648, %v1304_v28  ;;  %v1314_v58 = vand.u32 2147483647, %v1304_v28  ;;  %vm1310_vm2 = vweird.f32 %v1304_v28 }
 0x66b   :  { %v1317_v51 = vor.u32 1.1754944e-38, %v1316_v45  ;;  %vm1315_vm14 = vcmp.eq.f32.partialorder %v1314_v58, 8.507059e+37 }
 0x66c   :  { %v1698_v29 = vpop.eup %1697 }
 0x66d   :  { %v1327_v30 = vadd.f32 1.0, %v1698_v29 }
 0x66f   :  { %v1700_v31 = vpop.eup %1699  ;;  %1701 = vrcp.f32 %v1327_v30  ;;  %v1339_v60 = vand.u32 2147483648, %v1327_v30  ;;  %v1337_v62 = vand.u32 2147483647, %v1327_v30  ;;  %vm1333_vm0 = vweird.f32 %v1327_v30 }
 0x670   :  { %v1306_v42 = vmul.f32 %v1700_v31, %v1304_v28  ;;  %vm1311_vm1 = vweird.f32 %v1700_v31 }
 0x671   :  { %vm1312_vm11 = vmor %vm1310_vm2, %vm1311_vm1  ;;  %v1340_v40 = vor.u32 1.1754944e-38, %v1339_v60  ;;  %vm1338_vm7 = vcmp.eq.f32.partialorder %v1337_v62, 8.507059e+37  ;;  %vm1372_vm1 = vcmask 64518  }
 0x672   :  { %v1307_v44 = vsub.f32 1.0, %v1306_v42 }
 0x674   :  { %v1308_v49 = vmul.f32 %v1700_v31, %v1307_v44 }
 0x675   :  { %v1702_v12 = vpop.eup %1701 }
 0x676   :  { %v1329_v50 = vmul.f32 %v1702_v12, %v1327_v30  ;;  %v1309_v34 = vadd.f32 %v1700_v31, %v1308_v49  ;;  %vm1334_vm15 = vweird.f32 %v1702_v12 }
 0x677   :  { %vm1335_vm3 = vmor %vm1333_vm0, %vm1334_vm15 }
 0x678   :  { %v1330_v53 = vsub.f32 1.0, %v1329_v50  ;;  %v1313_v55 = vsel %vm1312_vm11, %v1700_v31, %v1309_v34 }
 0x679   :  { %v1318_v48 = vsel %vm1315_vm14, %v1317_v51, %v1313_v55 }
 0x67a   :  { %v1346_v59 = vmul.f32 %v1344_v56, %v1318_v48  ;;  %v1331_v37 = vmul.f32 %v1702_v12, %v1330_v53 }
 0x67c   :  { %v1347_v63 = vadd.f32 %v1346_v59, %v2326_v57  ;;  %v1332_v39 = vadd.f32 %v1702_v12, %v1331_v37 }
 0x67e   :  { %1703 = vtanh.f32 %v1347_v63  ;;  %v1336_v54 = vsel %vm1335_vm3, %v1702_v12, %v1332_v39 }
 0x67f   :  { %v1341_v0 = vsel %vm1338_vm7, %v1340_v40, %v1336_v54 }
 0x680   :  { %v1349_v19 = vsub.f32 1.0, %v1341_v0  ;;  %v1353_v17 = vmul.f32 %v1351_v2, %v1341_v0 }
 0x684   :  { %v1704_v3 = vpop.eup %1703 }
 0x685   :  { %v1350_v13 = vmul.f32 %v1704_v3, %v1349_v19 }
 0x687   :  { %v1354_v57 = vadd.f32 %v1353_v17, %v1350_v13 }
 0x689   :  { %1356 = vst.msk [vmem:[#allocation6 + $0x8] sm:$0xc0] %vm817_vm12, %v1354_v57  ;;  %v1362_v35 = vmul.f32 %v1360_v33, %v1354_v57 }
 0x68a   :  { %1371 = vst.msk [vmem:[#allocation4 - $0x6] sm:$0xc0] %vm817_vm12, %v1354_v57 }
 0x68b   :  { %v1363_v61 = vsel %vm817_vm12, %v1362_v35, 0.0  ;;  %vm953_vm12 = vcmp.eq.s32.totalorder %v1976_v26, 4  ;;  %1419 = dma.vmem_to_hbm [thread:$0]  %s1415_s22, 32, %s1417_s7, [#allocation5]  }
 0x68c   :  { %1364 = vadd.xlane.f32.xlu1 %v1363_v61  ;;  %v957_v14 = vsel %vm953_vm12, %v952_v10, %v955_v11  ;;  %1432 = dma.vmem_to_hbm [thread:$0]  %s1425_s8, 256, %s1427_s4, [#allocation5], %s1790_s10, %s1790_s10, %s1791_s24  }
 0x68d   :  { %v1092_v16 = vrot.slane %v957_v14, 6 }
 0x68f   :  { %v1094_v18 = vsel %vm1090_vm13, %v1089_v15, %v1092_v16 }
 0x690   :  { %v1230_v22 = vrot.slane %v1094_v18, 6 }
 0x692   :  { %v1232_v47 = vsel %vm1228_vm9, %v1227_v20, %v1230_v22 }
 0x693   :  { %v1368_v23 = vrot.slane %v1232_v47, 6 }
 0x6ff   :  { %v1365_v24 = vpop.xlane.xlu1 %1364 }
 0x700   :  { %v1370_v25 = vsel %vm1366_vm10, %v1365_v24, %v1368_v23 }
 0x701   :  { %v1373_v27 = vsel %vm1372_vm1, %v1370_v25, -inf }
 0x702   :  { %1374 = vmax.xlane.f32.xlu2 %v1373_v27 }
 0x775   :  { %v1375_v28 = vpop.xlane.xlu2 %1374 }
 0x776   :  { %v1376_v29 = vsub.f32 %v1370_v25, %v1375_v28 }
 0x778   :  { %v1377_v30 = vmul.f32 1.442695, %v1376_v29 }
 0x77a   :  { %1705 = vpow2.f32 %v1377_v30 }
 0x780   :  { %v1706_v31 = vpop.eup %1705 }
 0x781   :  { %v1379_v42 = vsel %vm1372_vm1, %v1706_v31, 0.0 }
 0x782   :  { %1380 = vadd.xlane.f32.xlu1 %v1379_v42 }
 0x7f5   :  { %v1381_v26 = vpop.xlane.xlu1 %1380 }
 0x7f6   :  { %1707 = vrcp.f32 %v1381_v26  ;;  %v1393_v52 = vand.u32 2147483648, %v1381_v26  ;;  %v1391_v49 = vand.u32 2147483647, %v1381_v26  ;;  %vm1387_vm11 = vweird.f32 %v1381_v26 }
 0x7f8   :  { %v1394_v12 = vor.u32 1.1754944e-38, %v1393_v52  ;;  %vm1392_vm15 = vcmp.eq.f32.partialorder %v1391_v49, 8.507059e+37 }
 0x7fc   :  { %v1708_v43 = vpop.eup %1707 }
 0x7fd   :  { %v1383_v44 = vmul.f32 %v1708_v43, %v1381_v26  ;;  %vm1388_vm2 = vweird.f32 %v1708_v43 }
 0x7fe   :  { %vm1389_vm14 = vmor %vm1387_vm11, %vm1388_vm2 }
 0x7ff   :  { %v1384_v45 = vsub.f32 1.0, %v1383_v44 }
 0x801   :  { %v1385_v46 = vmul.f32 %v1708_v43, %v1384_v45 }
 0x803   :  { %v1386_v58 = vadd.f32 %v1708_v43, %v1385_v46 }
 0x805   :  { %v1390_v50 = vsel %vm1389_vm14, %v1708_v43, %v1386_v58 }
 0x806   :  { %v1395_v34 = vsel %vm1392_vm15, %v1394_v12, %v1390_v50 }
 0x807   :  { %v1396_v51 = vmul.f32 %v1706_v31, %v1395_v34 }
 0x809   :  { %1397 = vst.msk [vmem:[#allocation2 - $0x6] sm:$0xc0] %vm1372_vm1, %v1396_v51 }
 0x80a   :  { %1408 = dma.vmem_to_hbm [thread:$0]  %s1404_s16, 32, %s1406_s5, [#allocation3]  }
 0x80b   :  { %1782 = dma.done.wait [#allocation3], 32  }
 0x80c   :  { %1783 = vsyncadd [#allocation3], 4294967264 }
 0x80d   :  { %1784 = dma.done.wait [#allocation5], 288  }
 0x80e   :  { %1785 = vsyncadd [#allocation5], 4294967008 }
 0x80f   :  { %1445 = vsyncpa [#allocation3], 1 }
 0x810   :  { %1446 = vsyncpa [#allocation5], 1 }

</bundles_post_ra>
